<compile_context>
chip_gen: v5e
topology: v5e:2x2
jax: 0.10.0
libtpu: 0.0.40
codegen_flags: <defaults>
</compile_context>

<pallas_src>
import math

import jax
import jax.numpy as jnp
from jax.experimental import pallas as pl
from jax.experimental.pallas import tpu as pltpu  # noqa: F401  (TPU backend)

# ---- model hyperparameters (small, consistent with the module's forward) ----
BATCH = 2
SEQ = 8
D_MODEL = 32          # embedding_dim
NHEAD = 4
HEAD_DIM = D_MODEL // NHEAD
FFN = 64              # dim_feedforward
VOCAB = 64            # vocab_size
VOCAB_PAD = 128       # lane-dense logits width (sliced back to VOCAB in wrapper)
NUM_LAYERS = 2
LN_EPS = 1e-5
SQRT_D = math.sqrt(D_MODEL)
ATTN_SCALE = 1.0 / math.sqrt(HEAD_DIM)
BS = BATCH * SEQ
SEQ_LOG2 = int(math.log2(SEQ))
assert SEQ == 1 << SEQ_LOG2

# packed gather table: rows [0, VOCAB)=embedding, [VOCAB, VOCAB+SEQ)=pos-enc, rest zero
TABLE_PAD = 128

# lane offsets inside the per-layer packed weight slab [Wqkv | Wo | Wff1]  -> (32, 192)
WA_QKV = 0
WA_WO = 3 * D_MODEL            # 96
WA_FF1 = WA_WO + D_MODEL       # 128
WA_WIDTH = WA_FF1 + FFN        # 192

# rows of the packed small-vector array (per layer: 8 rows; final row: output bias)
ROW_BQKV, ROW_BO, ROW_G1, ROW_B1, ROW_BFF1, ROW_BFF2, ROW_G2, ROW_B2 = range(8)
ROW_BOUT = NUM_LAYERS * 8      # 16
VEC_ROWS = ROW_BOUT + 1        # 17


# ----------------------------- Pallas kernel ---------------------------------
def _layer_norm(y, gamma, beta):
    mu = jnp.mean(y, axis=-1, keepdims=True)
    d = y - mu
    var = jnp.mean(d * d, axis=-1, keepdims=True)
    return d * jax.lax.rsqrt(var + LN_EPS) * gamma + beta


def _bdot(a_f32, w_bf16):
    """bf16-input MXU matmul with f32 accumulation."""
    return jnp.dot(a_f32.astype(jnp.bfloat16), w_bf16, preferred_element_type=jnp.float32)


def fused_forward_kernel(tok_ref, table_ref, wa_ref, wff2_ref, wout_ref, vec_ref, out_ref):
    """Whole TransformerNTP forward.

    tok_ref:   (B*S, 1)   int32   token ids, batch folded into sublanes
    table_ref: (128, D)   f32     rows [0,64)=embedding, [64,72)=pos enc, rest 0
    wa_ref:    (L, D, 192) bf16   per-layer [Wqkv | Wo | Wff1], [in, out] layout
    wff2_ref:  (L, FFN, D) bf16
    wout_ref:  (D, 128)    bf16   vocab projection, zero-padded to 128 lanes
    vec_ref:   (17, 128)   f32    per-layer biases/LayerNorm rows + output bias row
    out_ref:   (B, 128)    f32    last-position logits (lane padding sliced in wrapper)
    """
    # ---- fused embedding gather * sqrt(D) + positional encoding: one MXU pass ----
    lane = jax.lax.broadcasted_iota(jnp.int32, (BS, TABLE_PAD), 1)
    row = jax.lax.broadcasted_iota(jnp.int32, (BS, TABLE_PAD), 0)
    tok = tok_ref[...]                                          # (16, 1) int32
    sel_emb = lane == tok                                       # token one-hot (lanes < 64)
    sel_pe = (lane - VOCAB) == (row & (SEQ - 1))                # position one-hot (lanes 64..71)
    onehot = jnp.where(sel_emb, SQRT_D, 0.0) + jnp.where(sel_pe, 1.0, 0.0)
    x = jnp.dot(onehot, table_ref[...], preferred_element_type=jnp.float32)   # (16, 32)

    # block-diagonal batch mask: position i may only attend within its own sequence
    rb = jnp.right_shift(jax.lax.broadcasted_iota(jnp.int32, (BS, BS), 0), SEQ_LOG2)
    cb = jnp.right_shift(jax.lax.broadcasted_iota(jnp.int32, (BS, BS), 1), SEQ_LOG2)
    same_seq = rb == cb                                         # (16, 16) bool

    for l in range(NUM_LAYERS):                                 # static unroll (L = 2)
        wa = wa_ref[l]                                          # (32, 192) bf16
        wqkv = wa[:, WA_QKV:WA_QKV + 3 * D_MODEL]
        wo = wa[:, WA_WO:WA_WO + D_MODEL]
        wff1 = wa[:, WA_FF1:WA_FF1 + FFN]
        sp = vec_ref[l * 8:(l + 1) * 8, :]                      # (8, 128) f32
        bqkv = sp[ROW_BQKV, :3 * D_MODEL]
        bo = sp[ROW_BO, :D_MODEL]

        # ---- fused QKV projection for the whole batch-folded block ----
        qkv = _bdot(x, wqkv) + bqkv                             # (16, 96)
        q = qkv[:, :D_MODEL] * ATTN_SCALE                       # fold 1/sqrt(head_dim) into q
        k = qkv[:, D_MODEL:2 * D_MODEL]
        v = qkv[:, 2 * D_MODEL:]

        # ---- attention: per head, batch-folded score matmul + block-diag mask ----
        ctx_heads = []
        for h in range(NHEAD):                                  # static unroll (H = 4)
            cl = slice(h * HEAD_DIM, (h + 1) * HEAD_DIM)
            qh = q[:, cl].astype(jnp.bfloat16)                  # (16, 8)
            kh = k[:, cl].astype(jnp.bfloat16)
            vh = v[:, cl].astype(jnp.bfloat16)
            s = jnp.einsum('qd,kd->qk', qh, kh,
                           preferred_element_type=jnp.float32)               # (16, 16)
            s = jnp.where(same_seq, s, -1e30)                   # mask cross-sequence scores
            s = s - jnp.max(s, axis=-1, keepdims=True)
            p = jnp.exp(s)
            p = p / jnp.sum(p, axis=-1, keepdims=True)          # exact softmax (reference parity)
            ctx_heads.append(jnp.dot(p.astype(jnp.bfloat16), vh,
                                     preferred_element_type=jnp.float32))    # (16, 8)
        ctx = jnp.concatenate(ctx_heads, axis=1)                # (16, 32)
        attn = _bdot(ctx, wo) + bo                              # single out-projection matmul

        # ---- residual + LayerNorm1 (post-norm, nn.TransformerEncoderLayer default) ----
        y = _layer_norm(x + attn, sp[ROW_G1, :D_MODEL], sp[ROW_B1, :D_MODEL])

        # ---- feed-forward (ReLU) ----
        h1 = jnp.maximum(_bdot(y, wff1) + sp[ROW_BFF1, :FFN], 0.0)           # (16, 64)
        h2 = _bdot(h1, wff2_ref[l]) + sp[ROW_BFF2, :D_MODEL]                 # (16, 32)

        # ---- residual + LayerNorm2 ----
        x = _layer_norm(y + h2, sp[ROW_G2, :D_MODEL], sp[ROW_B2, :D_MODEL])

    # ---- vocab projection for the LAST position of each sequence only (lane-dense) ----
    x_last = jnp.concatenate(
        [x[(b + 1) * SEQ - 1:(b + 1) * SEQ, :] for b in range(BATCH)], axis=0)   # (B, 32)
    out_ref[...] = _bdot(x_last, wout_ref[...]) + vec_ref[ROW_BOUT, :]


# ------------------------------ wrapper ---------------------------------------
@jax.jit
def forward(tokens, params):
    # TODO(synk): dropout layers are eval-mode identities and are omitted.
    tok = tokens.reshape(BS, 1).astype(jnp.int32)               # fold batch -> sublanes
    logits_pad = pl.pallas_call(
        fused_forward_kernel,
        out_shape=jax.ShapeDtypeStruct((BATCH, VOCAB_PAD), jnp.float32),
    )(tok, params["table"], params["w_a"], params["wff2"], params["w_out"], params["vecs"])
    return logits_pad[:, :VOCAB]                                # drop lane padding


# --------------------------- parameter setup ----------------------------------
def xavier_uniform(key, shape):
    fan_in, fan_out = shape
    bound = math.sqrt(6.0 / (fan_in + fan_out))
    return jax.random.uniform(key, shape, jnp.float32, -bound, bound)


def make_positional_encoding(seq_len, d_model):
    position = jnp.arange(seq_len, dtype=jnp.float32)[:, None]
    div_term = jnp.exp(jnp.arange(0, d_model, 2, dtype=jnp.float32)
                       * (-math.log(10000.0) / d_model))
    pe = jnp.zeros((seq_len, d_model), jnp.float32)
    pe = pe.at[:, 0::2].set(jnp.sin(position * div_term))
    pe = pe.at[:, 1::2].set(jnp.cos(position * div_term))
    return pe


def init_params(key):
    """Weights pre-transposed to [in, out]; heavy weights bf16; small vectors packed."""
    keys = jax.random.split(key, 2 + NUM_LAYERS)

    # packed gather table: [embedding ; positional encoding ; zero padding]  (128, 32)
    emb = xavier_uniform(keys[0], (VOCAB, D_MODEL))
    pe = make_positional_encoding(SEQ, D_MODEL)
    table = jnp.zeros((TABLE_PAD, D_MODEL), jnp.float32)
    table = table.at[:VOCAB].set(emb).at[VOCAB:VOCAB + SEQ].set(pe)

    wa_l, wff2_l, vec_rows = [], [], []
    for l in range(NUM_LAYERS):
        lk = jax.random.split(keys[2 + l], 4)
        wqkv = xavier_uniform(lk[0], (D_MODEL, 3 * D_MODEL))
        wo = xavier_uniform(lk[1], (D_MODEL, D_MODEL))
        wff1 = xavier_uniform(lk[2], (D_MODEL, FFN))
        wff2 = xavier_uniform(lk[3], (FFN, D_MODEL))
        wa = jnp.concatenate([wqkv, wo, wff1], axis=1)          # (32, 192)
        assert wa.shape == (D_MODEL, WA_WIDTH)
        wa_l.append(wa)
        wff2_l.append(wff2)
        # packed small params: biases = 0, LayerNorm gamma = 1, beta = 0
        sp = jnp.zeros((8, 128), jnp.float32)
        sp = sp.at[ROW_G1, :D_MODEL].set(1.0).at[ROW_G2, :D_MODEL].set(1.0)
        vec_rows.append(sp)
    vecs = jnp.concatenate(vec_rows + [jnp.zeros((1, 128), jnp.float32)], axis=0)
    assert vecs.shape == (VEC_ROWS, 128)

    w_out = xavier_uniform(keys[1], (D_MODEL, VOCAB))

    return {
        "table": table,                                                  # (128, 32)  f32
        "w_a": jnp.stack(wa_l).astype(jnp.bfloat16),                     # (L, 32, 192) bf16
        "wff2": jnp.stack(wff2_l).astype(jnp.bfloat16),                  # (L, 64, 32)  bf16
        "w_out": jnp.pad(w_out, ((0, 0), (0, VOCAB_PAD - VOCAB))).astype(jnp.bfloat16),
        "vecs": vecs,                                                    # (17, 128)  f32
    }


# --------------------------------- main ----------------------------------------
if __name__ == "__main__":
    key = jax.random.PRNGKey(0)
    pkey, tkey = jax.random.split(key)
    params = init_params(pkey)
    tokens = jax.random.randint(tkey, (BATCH, SEQ), 0, VOCAB, dtype=jnp.int32)

    logits = jax.block_until_ready(forward(tokens, params))

    assert logits.shape == (BATCH, VOCAB), logits.shape
    assert bool(jnp.all(jnp.isfinite(logits)))
    print("KERNEL_OK")
</pallas_src>

<mosaic_0001>
module attributes {stable_mosaic.version = 11 : i64} {
  func.func @fused_forward_kernel(%arg0: memref<16x1xi32, #tpu.memory_space<vmem>>, %arg1: memref<128x32xf32, #tpu.memory_space<vmem>>, %arg2: memref<2x32x192xbf16, #tpu.memory_space<vmem>>, %arg3: memref<2x64x32xbf16, #tpu.memory_space<vmem>>, %arg4: memref<32x128xbf16, #tpu.memory_space<vmem>>, %arg5: memref<17x128xf32, #tpu.memory_space<vmem>>, %arg6: memref<2x128xf32, #tpu.memory_space<vmem>>) attributes {dimension_semantics = [], scalar_prefetch = 0 : i64, scratch_operands = 0 : i64, tpu.core_type = #tpu.core_type<tc>} {
    %0 = tpu.iota {dimensions = array<i32: 1>} : vector<16x128xi32>
    %1 = tpu.iota {dimensions = array<i32: 0>} : vector<16x128xi32>
    %c0 = arith.constant 0 : index
    %c0_0 = arith.constant 0 : index
    %2 = vector.load %arg0[%c0, %c0_0] : memref<16x1xi32, #tpu.memory_space<vmem>>, vector<16x1xi32>
    %3 = vector.broadcast %2 : vector<16x1xi32> to vector<16x128xi32>
    %4 = arith.cmpi eq, %0, %3 : vector<16x128xi32>
    %c64_i32 = arith.constant 64 : i32
    %5 = vector.broadcast %c64_i32 : i32 to vector<16x128xi32>
    %6 = arith.subi %0, %5 : vector<16x128xi32>
    %c7_i32 = arith.constant 7 : i32
    %7 = vector.broadcast %c7_i32 : i32 to vector<16x128xi32>
    %8 = arith.andi %1, %7 : vector<16x128xi32>
    %9 = arith.cmpi eq, %6, %8 : vector<16x128xi32>
    %cst = arith.constant 5.65685415 : f32
    %cst_1 = arith.constant 0.000000e+00 : f32
    %10 = vector.broadcast %cst : f32 to vector<16x128xf32>
    %11 = vector.broadcast %cst_1 : f32 to vector<16x128xf32>
    %12 = arith.select %4, %10, %11 : vector<16x128xi1>, vector<16x128xf32>
    %cst_2 = arith.constant 1.000000e+00 : f32
    %cst_3 = arith.constant 0.000000e+00 : f32
    %13 = vector.broadcast %cst_2 : f32 to vector<16x128xf32>
    %14 = vector.broadcast %cst_3 : f32 to vector<16x128xf32>
    %15 = arith.select %9, %13, %14 : vector<16x128xi1>, vector<16x128xf32>
    %16 = arith.addf %12, %15 : vector<16x128xf32>
    %c0_4 = arith.constant 0 : index
    %c0_5 = arith.constant 0 : index
    %17 = vector.load %arg1[%c0_4, %c0_5] : memref<128x32xf32, #tpu.memory_space<vmem>>, vector<128x32xf32>
    %cst_6 = arith.constant dense<0.000000e+00> : vector<16x32xf32>
    %18 = tpu.matmul %16, %17, %cst_6 {dimension_numbers = #tpu.dot_dimension_numbers<[1], [0], [0], [1], [0, 0, 1, 1], [], []>} : vector<16x128xf32>, vector<128x32xf32>, vector<16x32xf32> -> vector<16x32xf32>
    %19 = tpu.iota {dimensions = array<i32: 0>} : vector<16x16xi32>
    %c3_i32 = arith.constant 3 : i32
    %20 = vector.broadcast %c3_i32 : i32 to vector<16x16xi32>
    %21 = arith.shrsi %19, %20 : vector<16x16xi32>
    %22 = tpu.iota {dimensions = array<i32: 1>} : vector<16x16xi32>
    %c3_i32_7 = arith.constant 3 : i32
    %23 = vector.broadcast %c3_i32_7 : i32 to vector<16x16xi32>
    %24 = arith.shrsi %22, %23 : vector<16x16xi32>
    %25 = arith.cmpi eq, %21, %24 : vector<16x16xi32>
    %c0_8 = arith.constant 0 : index
    %c0_9 = arith.constant 0 : index
    %c0_10 = arith.constant 0 : index
    %26 = vector.load %arg2[%c0_8, %c0_9, %c0_10] : memref<2x32x192xbf16, #tpu.memory_space<vmem>>, vector<1x32x192xbf16>
    %27 = vector.shape_cast %26 : vector<1x32x192xbf16> to vector<32x192xbf16>
    %28 = vector.extract_strided_slice %27 {offsets = [0, 0], sizes = [32, 96], strides = [1, 1]} : vector<32x192xbf16> to vector<32x96xbf16>
    %29 = vector.extract_strided_slice %27 {offsets = [0, 96], sizes = [32, 32], strides = [1, 1]} : vector<32x192xbf16> to vector<32x32xbf16>
    %30 = vector.extract_strided_slice %27 {offsets = [0, 128], sizes = [32, 64], strides = [1, 1]} : vector<32x192xbf16> to vector<32x64xbf16>
    %c0_11 = arith.constant 0 : index
    %c0_12 = arith.constant 0 : index
    %31 = vector.load %arg5[%c0_11, %c0_12] : memref<17x128xf32, #tpu.memory_space<vmem>>, vector<8x128xf32>
    %32 = vector.extract_strided_slice %31 {offsets = [0, 0], sizes = [1, 96], strides = [1, 1]} : vector<8x128xf32> to vector<1x96xf32>
    %33 = vector.shape_cast %32 : vector<1x96xf32> to vector<96xf32>
    %34 = vector.extract_strided_slice %31 {offsets = [1, 0], sizes = [1, 32], strides = [1, 1]} : vector<8x128xf32> to vector<1x32xf32>
    %35 = vector.shape_cast %34 : vector<1x32xf32> to vector<32xf32>
    %36 = arith.truncf %18 : vector<16x32xf32> to vector<16x32xbf16>
    %cst_13 = arith.constant dense<0.000000e+00> : vector<16x96xf32>
    %37 = tpu.matmul %36, %28, %cst_13 {dimension_numbers = #tpu.dot_dimension_numbers<[1], [0], [0], [1], [0, 0, 1, 1], [], []>} : vector<16x32xbf16>, vector<32x96xbf16>, vector<16x96xf32> -> vector<16x96xf32>
    %38 = vector.shape_cast %33 : vector<96xf32> to vector<1x96xf32>
    %39 = vector.broadcast %38 : vector<1x96xf32> to vector<16x96xf32>
    %40 = arith.addf %37, %39 : vector<16x96xf32>
    %41 = vector.extract_strided_slice %40 {offsets = [0, 0], sizes = [16, 32], strides = [1, 1]} : vector<16x96xf32> to vector<16x32xf32>
    %cst_14 = arith.constant 0.353553385 : f32
    %42 = vector.broadcast %cst_14 : f32 to vector<16x32xf32>
    %43 = arith.mulf %41, %42 : vector<16x32xf32>
    %44 = vector.extract_strided_slice %40 {offsets = [0, 32], sizes = [16, 32], strides = [1, 1]} : vector<16x96xf32> to vector<16x32xf32>
    %45 = vector.extract_strided_slice %40 {offsets = [0, 64], sizes = [16, 32], strides = [1, 1]} : vector<16x96xf32> to vector<16x32xf32>
    %46 = vector.extract_strided_slice %43 {offsets = [0, 0], sizes = [16, 8], strides = [1, 1]} : vector<16x32xf32> to vector<16x8xf32>
    %47 = arith.truncf %46 : vector<16x8xf32> to vector<16x8xbf16>
    %48 = vector.extract_strided_slice %44 {offsets = [0, 0], sizes = [16, 8], strides = [1, 1]} : vector<16x32xf32> to vector<16x8xf32>
    %49 = arith.truncf %48 : vector<16x8xf32> to vector<16x8xbf16>
    %50 = vector.extract_strided_slice %45 {offsets = [0, 0], sizes = [16, 8], strides = [1, 1]} : vector<16x32xf32> to vector<16x8xf32>
    %51 = arith.truncf %50 : vector<16x8xf32> to vector<16x8xbf16>
    "tpu.trace_start"() <{level = 10 : i32, message = "qd,kd->qk"}> : () -> ()
    %cst_15 = arith.constant dense<0.000000e+00> : vector<16x16xf32>
    %52 = tpu.matmul %47, %49, %cst_15 {dimension_numbers = #tpu.dot_dimension_numbers<[1], [1], [0], [0], [0, 0, 1, 0], [], []>} : vector<16x8xbf16>, vector<16x8xbf16>, vector<16x16xf32> -> vector<16x16xf32>
    %cst_16 = arith.constant -1.000000e+30 : f32
    "tpu.trace_stop"() : () -> ()
    %53 = vector.broadcast %cst_16 : f32 to vector<16x16xf32>
    %54 = arith.select %25, %52, %53 : vector<16x16xi1>, vector<16x16xf32>
    %cst_17 = arith.constant dense<0xFF800000> : vector<16xf32>
    %55 = vector.multi_reduction <maximumf>, %54, %cst_17 [1] : vector<16x16xf32> to vector<16xf32>
    %56 = vector.shape_cast %55 : vector<16xf32> to vector<16x1xf32>
    %57 = vector.broadcast %56 : vector<16x1xf32> to vector<16x16xf32>
    %58 = arith.subf %54, %57 : vector<16x16xf32>
    %59 = math.exp %58 : vector<16x16xf32>
    %cst_18 = arith.constant dense<0.000000e+00> : vector<16xf32>
    %60 = vector.multi_reduction <add>, %59, %cst_18 [1] : vector<16x16xf32> to vector<16xf32>
    %61 = vector.shape_cast %60 : vector<16xf32> to vector<16x1xf32>
    %62 = vector.broadcast %61 : vector<16x1xf32> to vector<16x16xf32>
    %63 = arith.divf %59, %62 : vector<16x16xf32>
    %64 = arith.truncf %63 : vector<16x16xf32> to vector<16x16xbf16>
    %cst_19 = arith.constant dense<0.000000e+00> : vector<16x8xf32>
    %65 = tpu.matmul %64, %51, %cst_19 {dimension_numbers = #tpu.dot_dimension_numbers<[1], [0], [0], [1], [0, 0, 1, 1], [], []>} : vector<16x16xbf16>, vector<16x8xbf16>, vector<16x8xf32> -> vector<16x8xf32>
    %66 = vector.extract_strided_slice %43 {offsets = [0, 8], sizes = [16, 8], strides = [1, 1]} : vector<16x32xf32> to vector<16x8xf32>
    %67 = arith.truncf %66 : vector<16x8xf32> to vector<16x8xbf16>
    %68 = vector.extract_strided_slice %44 {offsets = [0, 8], sizes = [16, 8], strides = [1, 1]} : vector<16x32xf32> to vector<16x8xf32>
    %69 = arith.truncf %68 : vector<16x8xf32> to vector<16x8xbf16>
    %70 = vector.extract_strided_slice %45 {offsets = [0, 8], sizes = [16, 8], strides = [1, 1]} : vector<16x32xf32> to vector<16x8xf32>
    %71 = arith.truncf %70 : vector<16x8xf32> to vector<16x8xbf16>
    "tpu.trace_start"() <{level = 10 : i32, message = "qd,kd->qk"}> : () -> ()
    %cst_20 = arith.constant dense<0.000000e+00> : vector<16x16xf32>
    %72 = tpu.matmul %67, %69, %cst_20 {dimension_numbers = #tpu.dot_dimension_numbers<[1], [1], [0], [0], [0, 0, 1, 0], [], []>} : vector<16x8xbf16>, vector<16x8xbf16>, vector<16x16xf32> -> vector<16x16xf32>
    %cst_21 = arith.constant -1.000000e+30 : f32
    "tpu.trace_stop"() : () -> ()
    %73 = vector.broadcast %cst_21 : f32 to vector<16x16xf32>
    %74 = arith.select %25, %72, %73 : vector<16x16xi1>, vector<16x16xf32>
    %cst_22 = arith.constant dense<0xFF800000> : vector<16xf32>
    %75 = vector.multi_reduction <maximumf>, %74, %cst_22 [1] : vector<16x16xf32> to vector<16xf32>
    %76 = vector.shape_cast %75 : vector<16xf32> to vector<16x1xf32>
    %77 = vector.broadcast %76 : vector<16x1xf32> to vector<16x16xf32>
    %78 = arith.subf %74, %77 : vector<16x16xf32>
    %79 = math.exp %78 : vector<16x16xf32>
    %cst_23 = arith.constant dense<0.000000e+00> : vector<16xf32>
    %80 = vector.multi_reduction <add>, %79, %cst_23 [1] : vector<16x16xf32> to vector<16xf32>
    %81 = vector.shape_cast %80 : vector<16xf32> to vector<16x1xf32>
    %82 = vector.broadcast %81 : vector<16x1xf32> to vector<16x16xf32>
    %83 = arith.divf %79, %82 : vector<16x16xf32>
    %84 = arith.truncf %83 : vector<16x16xf32> to vector<16x16xbf16>
    %cst_24 = arith.constant dense<0.000000e+00> : vector<16x8xf32>
    %85 = tpu.matmul %84, %71, %cst_24 {dimension_numbers = #tpu.dot_dimension_numbers<[1], [0], [0], [1], [0, 0, 1, 1], [], []>} : vector<16x16xbf16>, vector<16x8xbf16>, vector<16x8xf32> -> vector<16x8xf32>
    %86 = vector.extract_strided_slice %43 {offsets = [0, 16], sizes = [16, 8], strides = [1, 1]} : vector<16x32xf32> to vector<16x8xf32>
    %87 = arith.truncf %86 : vector<16x8xf32> to vector<16x8xbf16>
    %88 = vector.extract_strided_slice %44 {offsets = [0, 16], sizes = [16, 8], strides = [1, 1]} : vector<16x32xf32> to vector<16x8xf32>
    %89 = arith.truncf %88 : vector<16x8xf32> to vector<16x8xbf16>
    %90 = vector.extract_strided_slice %45 {offsets = [0, 16], sizes = [16, 8], strides = [1, 1]} : vector<16x32xf32> to vector<16x8xf32>
    %91 = arith.truncf %90 : vector<16x8xf32> to vector<16x8xbf16>
    "tpu.trace_start"() <{level = 10 : i32, message = "qd,kd->qk"}> : () -> ()
    %cst_25 = arith.constant dense<0.000000e+00> : vector<16x16xf32>
    %92 = tpu.matmul %87, %89, %cst_25 {dimension_numbers = #tpu.dot_dimension_numbers<[1], [1], [0], [0], [0, 0, 1, 0], [], []>} : vector<16x8xbf16>, vector<16x8xbf16>, vector<16x16xf32> -> vector<16x16xf32>
    %cst_26 = arith.constant -1.000000e+30 : f32
    "tpu.trace_stop"() : () -> ()
    %93 = vector.broadcast %cst_26 : f32 to vector<16x16xf32>
    %94 = arith.select %25, %92, %93 : vector<16x16xi1>, vector<16x16xf32>
    %cst_27 = arith.constant dense<0xFF800000> : vector<16xf32>
    %95 = vector.multi_reduction <maximumf>, %94, %cst_27 [1] : vector<16x16xf32> to vector<16xf32>
    %96 = vector.shape_cast %95 : vector<16xf32> to vector<16x1xf32>
    %97 = vector.broadcast %96 : vector<16x1xf32> to vector<16x16xf32>
    %98 = arith.subf %94, %97 : vector<16x16xf32>
    %99 = math.exp %98 : vector<16x16xf32>
    %cst_28 = arith.constant dense<0.000000e+00> : vector<16xf32>
    %100 = vector.multi_reduction <add>, %99, %cst_28 [1] : vector<16x16xf32> to vector<16xf32>
    %101 = vector.shape_cast %100 : vector<16xf32> to vector<16x1xf32>
    %102 = vector.broadcast %101 : vector<16x1xf32> to vector<16x16xf32>
    %103 = arith.divf %99, %102 : vector<16x16xf32>
    %104 = arith.truncf %103 : vector<16x16xf32> to vector<16x16xbf16>
    %cst_29 = arith.constant dense<0.000000e+00> : vector<16x8xf32>
    %105 = tpu.matmul %104, %91, %cst_29 {dimension_numbers = #tpu.dot_dimension_numbers<[1], [0], [0], [1], [0, 0, 1, 1], [], []>} : vector<16x16xbf16>, vector<16x8xbf16>, vector<16x8xf32> -> vector<16x8xf32>
    %106 = vector.extract_strided_slice %43 {offsets = [0, 24], sizes = [16, 8], strides = [1, 1]} : vector<16x32xf32> to vector<16x8xf32>
    %107 = arith.truncf %106 : vector<16x8xf32> to vector<16x8xbf16>
    %108 = vector.extract_strided_slice %44 {offsets = [0, 24], sizes = [16, 8], strides = [1, 1]} : vector<16x32xf32> to vector<16x8xf32>
    %109 = arith.truncf %108 : vector<16x8xf32> to vector<16x8xbf16>
    %110 = vector.extract_strided_slice %45 {offsets = [0, 24], sizes = [16, 8], strides = [1, 1]} : vector<16x32xf32> to vector<16x8xf32>
    %111 = arith.truncf %110 : vector<16x8xf32> to vector<16x8xbf16>
    "tpu.trace_start"() <{level = 10 : i32, message = "qd,kd->qk"}> : () -> ()
    %cst_30 = arith.constant dense<0.000000e+00> : vector<16x16xf32>
    %112 = tpu.matmul %107, %109, %cst_30 {dimension_numbers = #tpu.dot_dimension_numbers<[1], [1], [0], [0], [0, 0, 1, 0], [], []>} : vector<16x8xbf16>, vector<16x8xbf16>, vector<16x16xf32> -> vector<16x16xf32>
    %cst_31 = arith.constant -1.000000e+30 : f32
    "tpu.trace_stop"() : () -> ()
    %113 = vector.broadcast %cst_31 : f32 to vector<16x16xf32>
    %114 = arith.select %25, %112, %113 : vector<16x16xi1>, vector<16x16xf32>
    %cst_32 = arith.constant dense<0xFF800000> : vector<16xf32>
    %115 = vector.multi_reduction <maximumf>, %114, %cst_32 [1] : vector<16x16xf32> to vector<16xf32>
    %116 = vector.shape_cast %115 : vector<16xf32> to vector<16x1xf32>
    %117 = vector.broadcast %116 : vector<16x1xf32> to vector<16x16xf32>
    %118 = arith.subf %114, %117 : vector<16x16xf32>
    %119 = math.exp %118 : vector<16x16xf32>
    %cst_33 = arith.constant dense<0.000000e+00> : vector<16xf32>
    %120 = vector.multi_reduction <add>, %119, %cst_33 [1] : vector<16x16xf32> to vector<16xf32>
    %121 = vector.shape_cast %120 : vector<16xf32> to vector<16x1xf32>
    %122 = vector.broadcast %121 : vector<16x1xf32> to vector<16x16xf32>
    %123 = arith.divf %119, %122 : vector<16x16xf32>
    %124 = arith.truncf %123 : vector<16x16xf32> to vector<16x16xbf16>
    %cst_34 = arith.constant dense<0.000000e+00> : vector<16x8xf32>
    %125 = tpu.matmul %124, %111, %cst_34 {dimension_numbers = #tpu.dot_dimension_numbers<[1], [0], [0], [1], [0, 0, 1, 1], [], []>} : vector<16x16xbf16>, vector<16x8xbf16>, vector<16x8xf32> -> vector<16x8xf32>
    %126 = tpu.concatenate %65, %85, %105, %125 in 1 : vector<16x8xf32>, vector<16x8xf32>, vector<16x8xf32>, vector<16x8xf32> -> vector<16x32xf32>
    %127 = arith.truncf %126 : vector<16x32xf32> to vector<16x32xbf16>
    %cst_35 = arith.constant dense<0.000000e+00> : vector<16x32xf32>
    %128 = tpu.matmul %127, %29, %cst_35 {dimension_numbers = #tpu.dot_dimension_numbers<[1], [0], [0], [1], [0, 0, 1, 1], [], []>} : vector<16x32xbf16>, vector<32x32xbf16>, vector<16x32xf32> -> vector<16x32xf32>
    %129 = vector.shape_cast %35 : vector<32xf32> to vector<1x32xf32>
    %130 = vector.broadcast %129 : vector<1x32xf32> to vector<16x32xf32>
    %131 = arith.addf %128, %130 : vector<16x32xf32>
    %132 = arith.addf %18, %131 : vector<16x32xf32>
    %133 = vector.extract_strided_slice %31 {offsets = [2, 0], sizes = [1, 32], strides = [1, 1]} : vector<8x128xf32> to vector<1x32xf32>
    %134 = vector.shape_cast %133 : vector<1x32xf32> to vector<32xf32>
    %135 = vector.extract_strided_slice %31 {offsets = [3, 0], sizes = [1, 32], strides = [1, 1]} : vector<8x128xf32> to vector<1x32xf32>
    %136 = vector.shape_cast %135 : vector<1x32xf32> to vector<32xf32>
    %cst_36 = arith.constant dense<0.000000e+00> : vector<16xf32>
    %137 = vector.multi_reduction <add>, %132, %cst_36 [1] : vector<16x32xf32> to vector<16xf32>
    %138 = vector.shape_cast %137 : vector<16xf32> to vector<16x1xf32>
    %cst_37 = arith.constant 3.200000e+01 : f32
    %139 = vector.broadcast %cst_37 : f32 to vector<16x1xf32>
    %140 = arith.divf %138, %139 : vector<16x1xf32>
    %141 = vector.broadcast %140 : vector<16x1xf32> to vector<16x32xf32>
    %142 = arith.subf %132, %141 : vector<16x32xf32>
    %143 = arith.mulf %142, %142 : vector<16x32xf32>
    %cst_38 = arith.constant dense<0.000000e+00> : vector<16xf32>
    %144 = vector.multi_reduction <add>, %143, %cst_38 [1] : vector<16x32xf32> to vector<16xf32>
    %145 = vector.shape_cast %144 : vector<16xf32> to vector<16x1xf32>
    %cst_39 = arith.constant 3.200000e+01 : f32
    %146 = vector.broadcast %cst_39 : f32 to vector<16x1xf32>
    %147 = arith.divf %145, %146 : vector<16x1xf32>
    %cst_40 = arith.constant 9.99999974E-6 : f32
    %148 = vector.broadcast %cst_40 : f32 to vector<16x1xf32>
    %149 = arith.addf %147, %148 : vector<16x1xf32>
    %150 = math.rsqrt %149 : vector<16x1xf32>
    %151 = vector.broadcast %150 : vector<16x1xf32> to vector<16x32xf32>
    %152 = arith.mulf %142, %151 : vector<16x32xf32>
    %153 = vector.shape_cast %134 : vector<32xf32> to vector<1x32xf32>
    %154 = vector.broadcast %153 : vector<1x32xf32> to vector<16x32xf32>
    %155 = arith.mulf %152, %154 : vector<16x32xf32>
    %156 = vector.shape_cast %136 : vector<32xf32> to vector<1x32xf32>
    %157 = vector.broadcast %156 : vector<1x32xf32> to vector<16x32xf32>
    %158 = arith.addf %155, %157 : vector<16x32xf32>
    %159 = arith.truncf %158 : vector<16x32xf32> to vector<16x32xbf16>
    %cst_41 = arith.constant dense<0.000000e+00> : vector<16x64xf32>
    %160 = tpu.matmul %159, %30, %cst_41 {dimension_numbers = #tpu.dot_dimension_numbers<[1], [0], [0], [1], [0, 0, 1, 1], [], []>} : vector<16x32xbf16>, vector<32x64xbf16>, vector<16x64xf32> -> vector<16x64xf32>
    %161 = vector.extract_strided_slice %31 {offsets = [4, 0], sizes = [1, 64], strides = [1, 1]} : vector<8x128xf32> to vector<1x64xf32>
    %162 = vector.shape_cast %161 : vector<1x64xf32> to vector<64xf32>
    %163 = vector.shape_cast %162 : vector<64xf32> to vector<1x64xf32>
    %164 = vector.broadcast %163 : vector<1x64xf32> to vector<16x64xf32>
    %165 = arith.addf %160, %164 : vector<16x64xf32>
    %cst_42 = arith.constant 0.000000e+00 : f32
    %166 = vector.broadcast %cst_42 : f32 to vector<16x64xf32>
    %167 = arith.maximumf %165, %166 : vector<16x64xf32>
    %c0_43 = arith.constant 0 : index
    %c0_44 = arith.constant 0 : index
    %c0_45 = arith.constant 0 : index
    %168 = vector.load %arg3[%c0_43, %c0_44, %c0_45] : memref<2x64x32xbf16, #tpu.memory_space<vmem>>, vector<1x64x32xbf16>
    %169 = vector.shape_cast %168 : vector<1x64x32xbf16> to vector<64x32xbf16>
    %170 = arith.truncf %167 : vector<16x64xf32> to vector<16x64xbf16>
    %cst_46 = arith.constant dense<0.000000e+00> : vector<16x32xf32>
    %171 = tpu.matmul %170, %169, %cst_46 {dimension_numbers = #tpu.dot_dimension_numbers<[1], [0], [0], [1], [0, 0, 1, 1], [], []>} : vector<16x64xbf16>, vector<64x32xbf16>, vector<16x32xf32> -> vector<16x32xf32>
    %172 = vector.extract_strided_slice %31 {offsets = [5, 0], sizes = [1, 32], strides = [1, 1]} : vector<8x128xf32> to vector<1x32xf32>
    %173 = vector.shape_cast %172 : vector<1x32xf32> to vector<32xf32>
    %174 = vector.shape_cast %173 : vector<32xf32> to vector<1x32xf32>
    %175 = vector.broadcast %174 : vector<1x32xf32> to vector<16x32xf32>
    %176 = arith.addf %171, %175 : vector<16x32xf32>
    %177 = arith.addf %158, %176 : vector<16x32xf32>
    %178 = vector.extract_strided_slice %31 {offsets = [6, 0], sizes = [1, 32], strides = [1, 1]} : vector<8x128xf32> to vector<1x32xf32>
    %179 = vector.shape_cast %178 : vector<1x32xf32> to vector<32xf32>
    %180 = vector.extract_strided_slice %31 {offsets = [7, 0], sizes = [1, 32], strides = [1, 1]} : vector<8x128xf32> to vector<1x32xf32>
    %181 = vector.shape_cast %180 : vector<1x32xf32> to vector<32xf32>
    %cst_47 = arith.constant dense<0.000000e+00> : vector<16xf32>
    %182 = vector.multi_reduction <add>, %177, %cst_47 [1] : vector<16x32xf32> to vector<16xf32>
    %183 = vector.shape_cast %182 : vector<16xf32> to vector<16x1xf32>
    %cst_48 = arith.constant 3.200000e+01 : f32
    %184 = vector.broadcast %cst_48 : f32 to vector<16x1xf32>
    %185 = arith.divf %183, %184 : vector<16x1xf32>
    %186 = vector.broadcast %185 : vector<16x1xf32> to vector<16x32xf32>
    %187 = arith.subf %177, %186 : vector<16x32xf32>
    %188 = arith.mulf %187, %187 : vector<16x32xf32>
    %cst_49 = arith.constant dense<0.000000e+00> : vector<16xf32>
    %189 = vector.multi_reduction <add>, %188, %cst_49 [1] : vector<16x32xf32> to vector<16xf32>
    %190 = vector.shape_cast %189 : vector<16xf32> to vector<16x1xf32>
    %cst_50 = arith.constant 3.200000e+01 : f32
    %191 = vector.broadcast %cst_50 : f32 to vector<16x1xf32>
    %192 = arith.divf %190, %191 : vector<16x1xf32>
    %cst_51 = arith.constant 9.99999974E-6 : f32
    %193 = vector.broadcast %cst_51 : f32 to vector<16x1xf32>
    %194 = arith.addf %192, %193 : vector<16x1xf32>
    %195 = math.rsqrt %194 : vector<16x1xf32>
    %196 = vector.broadcast %195 : vector<16x1xf32> to vector<16x32xf32>
    %197 = arith.mulf %187, %196 : vector<16x32xf32>
    %198 = vector.shape_cast %179 : vector<32xf32> to vector<1x32xf32>
    %199 = vector.broadcast %198 : vector<1x32xf32> to vector<16x32xf32>
    %200 = arith.mulf %197, %199 : vector<16x32xf32>
    %201 = vector.shape_cast %181 : vector<32xf32> to vector<1x32xf32>
    %202 = vector.broadcast %201 : vector<1x32xf32> to vector<16x32xf32>
    %203 = arith.addf %200, %202 : vector<16x32xf32>
    %c1 = arith.constant 1 : index
    %c0_52 = arith.constant 0 : index
    %c0_53 = arith.constant 0 : index
    %204 = vector.load %arg2[%c1, %c0_52, %c0_53] : memref<2x32x192xbf16, #tpu.memory_space<vmem>>, vector<1x32x192xbf16>
    %205 = vector.shape_cast %204 : vector<1x32x192xbf16> to vector<32x192xbf16>
    %206 = vector.extract_strided_slice %205 {offsets = [0, 0], sizes = [32, 96], strides = [1, 1]} : vector<32x192xbf16> to vector<32x96xbf16>
    %207 = vector.extract_strided_slice %205 {offsets = [0, 96], sizes = [32, 32], strides = [1, 1]} : vector<32x192xbf16> to vector<32x32xbf16>
    %208 = vector.extract_strided_slice %205 {offsets = [0, 128], sizes = [32, 64], strides = [1, 1]} : vector<32x192xbf16> to vector<32x64xbf16>
    %c8 = arith.constant 8 : index
    %c0_54 = arith.constant 0 : index
    %209 = vector.load %arg5[%c8, %c0_54] : memref<17x128xf32, #tpu.memory_space<vmem>>, vector<8x128xf32>
    %210 = vector.extract_strided_slice %209 {offsets = [0, 0], sizes = [1, 96], strides = [1, 1]} : vector<8x128xf32> to vector<1x96xf32>
    %211 = vector.shape_cast %210 : vector<1x96xf32> to vector<96xf32>
    %212 = vector.extract_strided_slice %209 {offsets = [1, 0], sizes = [1, 32], strides = [1, 1]} : vector<8x128xf32> to vector<1x32xf32>
    %213 = vector.shape_cast %212 : vector<1x32xf32> to vector<32xf32>
    %214 = arith.truncf %203 : vector<16x32xf32> to vector<16x32xbf16>
    %cst_55 = arith.constant dense<0.000000e+00> : vector<16x96xf32>
    %215 = tpu.matmul %214, %206, %cst_55 {dimension_numbers = #tpu.dot_dimension_numbers<[1], [0], [0], [1], [0, 0, 1, 1], [], []>} : vector<16x32xbf16>, vector<32x96xbf16>, vector<16x96xf32> -> vector<16x96xf32>
    %216 = vector.shape_cast %211 : vector<96xf32> to vector<1x96xf32>
    %217 = vector.broadcast %216 : vector<1x96xf32> to vector<16x96xf32>
    %218 = arith.addf %215, %217 : vector<16x96xf32>
    %219 = vector.extract_strided_slice %218 {offsets = [0, 0], sizes = [16, 32], strides = [1, 1]} : vector<16x96xf32> to vector<16x32xf32>
    %cst_56 = arith.constant 0.353553385 : f32
    %220 = vector.broadcast %cst_56 : f32 to vector<16x32xf32>
    %221 = arith.mulf %219, %220 : vector<16x32xf32>
    %222 = vector.extract_strided_slice %218 {offsets = [0, 32], sizes = [16, 32], strides = [1, 1]} : vector<16x96xf32> to vector<16x32xf32>
    %223 = vector.extract_strided_slice %218 {offsets = [0, 64], sizes = [16, 32], strides = [1, 1]} : vector<16x96xf32> to vector<16x32xf32>
    %224 = vector.extract_strided_slice %221 {offsets = [0, 0], sizes = [16, 8], strides = [1, 1]} : vector<16x32xf32> to vector<16x8xf32>
    %225 = arith.truncf %224 : vector<16x8xf32> to vector<16x8xbf16>
    %226 = vector.extract_strided_slice %222 {offsets = [0, 0], sizes = [16, 8], strides = [1, 1]} : vector<16x32xf32> to vector<16x8xf32>
    %227 = arith.truncf %226 : vector<16x8xf32> to vector<16x8xbf16>
    %228 = vector.extract_strided_slice %223 {offsets = [0, 0], sizes = [16, 8], strides = [1, 1]} : vector<16x32xf32> to vector<16x8xf32>
    %229 = arith.truncf %228 : vector<16x8xf32> to vector<16x8xbf16>
    "tpu.trace_start"() <{level = 10 : i32, message = "qd,kd->qk"}> : () -> ()
    %cst_57 = arith.constant dense<0.000000e+00> : vector<16x16xf32>
    %230 = tpu.matmul %225, %227, %cst_57 {dimension_numbers = #tpu.dot_dimension_numbers<[1], [1], [0], [0], [0, 0, 1, 0], [], []>} : vector<16x8xbf16>, vector<16x8xbf16>, vector<16x16xf32> -> vector<16x16xf32>
    %cst_58 = arith.constant -1.000000e+30 : f32
    "tpu.trace_stop"() : () -> ()
    %231 = vector.broadcast %cst_58 : f32 to vector<16x16xf32>
    %232 = arith.select %25, %230, %231 : vector<16x16xi1>, vector<16x16xf32>
    %cst_59 = arith.constant dense<0xFF800000> : vector<16xf32>
    %233 = vector.multi_reduction <maximumf>, %232, %cst_59 [1] : vector<16x16xf32> to vector<16xf32>
    %234 = vector.shape_cast %233 : vector<16xf32> to vector<16x1xf32>
    %235 = vector.broadcast %234 : vector<16x1xf32> to vector<16x16xf32>
    %236 = arith.subf %232, %235 : vector<16x16xf32>
    %237 = math.exp %236 : vector<16x16xf32>
    %cst_60 = arith.constant dense<0.000000e+00> : vector<16xf32>
    %238 = vector.multi_reduction <add>, %237, %cst_60 [1] : vector<16x16xf32> to vector<16xf32>
    %239 = vector.shape_cast %238 : vector<16xf32> to vector<16x1xf32>
    %240 = vector.broadcast %239 : vector<16x1xf32> to vector<16x16xf32>
    %241 = arith.divf %237, %240 : vector<16x16xf32>
    %242 = arith.truncf %241 : vector<16x16xf32> to vector<16x16xbf16>
    %cst_61 = arith.constant dense<0.000000e+00> : vector<16x8xf32>
    %243 = tpu.matmul %242, %229, %cst_61 {dimension_numbers = #tpu.dot_dimension_numbers<[1], [0], [0], [1], [0, 0, 1, 1], [], []>} : vector<16x16xbf16>, vector<16x8xbf16>, vector<16x8xf32> -> vector<16x8xf32>
    %244 = vector.extract_strided_slice %221 {offsets = [0, 8], sizes = [16, 8], strides = [1, 1]} : vector<16x32xf32> to vector<16x8xf32>
    %245 = arith.truncf %244 : vector<16x8xf32> to vector<16x8xbf16>
    %246 = vector.extract_strided_slice %222 {offsets = [0, 8], sizes = [16, 8], strides = [1, 1]} : vector<16x32xf32> to vector<16x8xf32>
    %247 = arith.truncf %246 : vector<16x8xf32> to vector<16x8xbf16>
    %248 = vector.extract_strided_slice %223 {offsets = [0, 8], sizes = [16, 8], strides = [1, 1]} : vector<16x32xf32> to vector<16x8xf32>
    %249 = arith.truncf %248 : vector<16x8xf32> to vector<16x8xbf16>
    "tpu.trace_start"() <{level = 10 : i32, message = "qd,kd->qk"}> : () -> ()
    %cst_62 = arith.constant dense<0.000000e+00> : vector<16x16xf32>
    %250 = tpu.matmul %245, %247, %cst_62 {dimension_numbers = #tpu.dot_dimension_numbers<[1], [1], [0], [0], [0, 0, 1, 0], [], []>} : vector<16x8xbf16>, vector<16x8xbf16>, vector<16x16xf32> -> vector<16x16xf32>
    %cst_63 = arith.constant -1.000000e+30 : f32
    "tpu.trace_stop"() : () -> ()
    %251 = vector.broadcast %cst_63 : f32 to vector<16x16xf32>
    %252 = arith.select %25, %250, %251 : vector<16x16xi1>, vector<16x16xf32>
    %cst_64 = arith.constant dense<0xFF800000> : vector<16xf32>
    %253 = vector.multi_reduction <maximumf>, %252, %cst_64 [1] : vector<16x16xf32> to vector<16xf32>
    %254 = vector.shape_cast %253 : vector<16xf32> to vector<16x1xf32>
    %255 = vector.broadcast %254 : vector<16x1xf32> to vector<16x16xf32>
    %256 = arith.subf %252, %255 : vector<16x16xf32>
    %257 = math.exp %256 : vector<16x16xf32>
    %cst_65 = arith.constant dense<0.000000e+00> : vector<16xf32>
    %258 = vector.multi_reduction <add>, %257, %cst_65 [1] : vector<16x16xf32> to vector<16xf32>
    %259 = vector.shape_cast %258 : vector<16xf32> to vector<16x1xf32>
    %260 = vector.broadcast %259 : vector<16x1xf32> to vector<16x16xf32>
    %261 = arith.divf %257, %260 : vector<16x16xf32>
    %262 = arith.truncf %261 : vector<16x16xf32> to vector<16x16xbf16>
    %cst_66 = arith.constant dense<0.000000e+00> : vector<16x8xf32>
    %263 = tpu.matmul %262, %249, %cst_66 {dimension_numbers = #tpu.dot_dimension_numbers<[1], [0], [0], [1], [0, 0, 1, 1], [], []>} : vector<16x16xbf16>, vector<16x8xbf16>, vector<16x8xf32> -> vector<16x8xf32>
    %264 = vector.extract_strided_slice %221 {offsets = [0, 16], sizes = [16, 8], strides = [1, 1]} : vector<16x32xf32> to vector<16x8xf32>
    %265 = arith.truncf %264 : vector<16x8xf32> to vector<16x8xbf16>
    %266 = vector.extract_strided_slice %222 {offsets = [0, 16], sizes = [16, 8], strides = [1, 1]} : vector<16x32xf32> to vector<16x8xf32>
    %267 = arith.truncf %266 : vector<16x8xf32> to vector<16x8xbf16>
    %268 = vector.extract_strided_slice %223 {offsets = [0, 16], sizes = [16, 8], strides = [1, 1]} : vector<16x32xf32> to vector<16x8xf32>
    %269 = arith.truncf %268 : vector<16x8xf32> to vector<16x8xbf16>
    "tpu.trace_start"() <{level = 10 : i32, message = "qd,kd->qk"}> : () -> ()
    %cst_67 = arith.constant dense<0.000000e+00> : vector<16x16xf32>
    %270 = tpu.matmul %265, %267, %cst_67 {dimension_numbers = #tpu.dot_dimension_numbers<[1], [1], [0], [0], [0, 0, 1, 0], [], []>} : vector<16x8xbf16>, vector<16x8xbf16>, vector<16x16xf32> -> vector<16x16xf32>
    %cst_68 = arith.constant -1.000000e+30 : f32
    "tpu.trace_stop"() : () -> ()
    %271 = vector.broadcast %cst_68 : f32 to vector<16x16xf32>
    %272 = arith.select %25, %270, %271 : vector<16x16xi1>, vector<16x16xf32>
    %cst_69 = arith.constant dense<0xFF800000> : vector<16xf32>
    %273 = vector.multi_reduction <maximumf>, %272, %cst_69 [1] : vector<16x16xf32> to vector<16xf32>
    %274 = vector.shape_cast %273 : vector<16xf32> to vector<16x1xf32>
    %275 = vector.broadcast %274 : vector<16x1xf32> to vector<16x16xf32>
    %276 = arith.subf %272, %275 : vector<16x16xf32>
    %277 = math.exp %276 : vector<16x16xf32>
    %cst_70 = arith.constant dense<0.000000e+00> : vector<16xf32>
    %278 = vector.multi_reduction <add>, %277, %cst_70 [1] : vector<16x16xf32> to vector<16xf32>
    %279 = vector.shape_cast %278 : vector<16xf32> to vector<16x1xf32>
    %280 = vector.broadcast %279 : vector<16x1xf32> to vector<16x16xf32>
    %281 = arith.divf %277, %280 : vector<16x16xf32>
    %282 = arith.truncf %281 : vector<16x16xf32> to vector<16x16xbf16>
    %cst_71 = arith.constant dense<0.000000e+00> : vector<16x8xf32>
    %283 = tpu.matmul %282, %269, %cst_71 {dimension_numbers = #tpu.dot_dimension_numbers<[1], [0], [0], [1], [0, 0, 1, 1], [], []>} : vector<16x16xbf16>, vector<16x8xbf16>, vector<16x8xf32> -> vector<16x8xf32>
    %284 = vector.extract_strided_slice %221 {offsets = [0, 24], sizes = [16, 8], strides = [1, 1]} : vector<16x32xf32> to vector<16x8xf32>
    %285 = arith.truncf %284 : vector<16x8xf32> to vector<16x8xbf16>
    %286 = vector.extract_strided_slice %222 {offsets = [0, 24], sizes = [16, 8], strides = [1, 1]} : vector<16x32xf32> to vector<16x8xf32>
    %287 = arith.truncf %286 : vector<16x8xf32> to vector<16x8xbf16>
    %288 = vector.extract_strided_slice %223 {offsets = [0, 24], sizes = [16, 8], strides = [1, 1]} : vector<16x32xf32> to vector<16x8xf32>
    %289 = arith.truncf %288 : vector<16x8xf32> to vector<16x8xbf16>
    "tpu.trace_start"() <{level = 10 : i32, message = "qd,kd->qk"}> : () -> ()
    %cst_72 = arith.constant dense<0.000000e+00> : vector<16x16xf32>
    %290 = tpu.matmul %285, %287, %cst_72 {dimension_numbers = #tpu.dot_dimension_numbers<[1], [1], [0], [0], [0, 0, 1, 0], [], []>} : vector<16x8xbf16>, vector<16x8xbf16>, vector<16x16xf32> -> vector<16x16xf32>
    %cst_73 = arith.constant -1.000000e+30 : f32
    "tpu.trace_stop"() : () -> ()
    %291 = vector.broadcast %cst_73 : f32 to vector<16x16xf32>
    %292 = arith.select %25, %290, %291 : vector<16x16xi1>, vector<16x16xf32>
    %cst_74 = arith.constant dense<0xFF800000> : vector<16xf32>
    %293 = vector.multi_reduction <maximumf>, %292, %cst_74 [1] : vector<16x16xf32> to vector<16xf32>
    %294 = vector.shape_cast %293 : vector<16xf32> to vector<16x1xf32>
    %295 = vector.broadcast %294 : vector<16x1xf32> to vector<16x16xf32>
    %296 = arith.subf %292, %295 : vector<16x16xf32>
    %297 = math.exp %296 : vector<16x16xf32>
    %cst_75 = arith.constant dense<0.000000e+00> : vector<16xf32>
    %298 = vector.multi_reduction <add>, %297, %cst_75 [1] : vector<16x16xf32> to vector<16xf32>
    %299 = vector.shape_cast %298 : vector<16xf32> to vector<16x1xf32>
    %300 = vector.broadcast %299 : vector<16x1xf32> to vector<16x16xf32>
    %301 = arith.divf %297, %300 : vector<16x16xf32>
    %302 = arith.truncf %301 : vector<16x16xf32> to vector<16x16xbf16>
    %cst_76 = arith.constant dense<0.000000e+00> : vector<16x8xf32>
    %303 = tpu.matmul %302, %289, %cst_76 {dimension_numbers = #tpu.dot_dimension_numbers<[1], [0], [0], [1], [0, 0, 1, 1], [], []>} : vector<16x16xbf16>, vector<16x8xbf16>, vector<16x8xf32> -> vector<16x8xf32>
    %304 = tpu.concatenate %243, %263, %283, %303 in 1 : vector<16x8xf32>, vector<16x8xf32>, vector<16x8xf32>, vector<16x8xf32> -> vector<16x32xf32>
    %305 = arith.truncf %304 : vector<16x32xf32> to vector<16x32xbf16>
    %cst_77 = arith.constant dense<0.000000e+00> : vector<16x32xf32>
    %306 = tpu.matmul %305, %207, %cst_77 {dimension_numbers = #tpu.dot_dimension_numbers<[1], [0], [0], [1], [0, 0, 1, 1], [], []>} : vector<16x32xbf16>, vector<32x32xbf16>, vector<16x32xf32> -> vector<16x32xf32>
    %307 = vector.shape_cast %213 : vector<32xf32> to vector<1x32xf32>
    %308 = vector.broadcast %307 : vector<1x32xf32> to vector<16x32xf32>
    %309 = arith.addf %306, %308 : vector<16x32xf32>
    %310 = arith.addf %203, %309 : vector<16x32xf32>
    %311 = vector.extract_strided_slice %209 {offsets = [2, 0], sizes = [1, 32], strides = [1, 1]} : vector<8x128xf32> to vector<1x32xf32>
    %312 = vector.shape_cast %311 : vector<1x32xf32> to vector<32xf32>
    %313 = vector.extract_strided_slice %209 {offsets = [3, 0], sizes = [1, 32], strides = [1, 1]} : vector<8x128xf32> to vector<1x32xf32>
    %314 = vector.shape_cast %313 : vector<1x32xf32> to vector<32xf32>
    %cst_78 = arith.constant dense<0.000000e+00> : vector<16xf32>
    %315 = vector.multi_reduction <add>, %310, %cst_78 [1] : vector<16x32xf32> to vector<16xf32>
    %316 = vector.shape_cast %315 : vector<16xf32> to vector<16x1xf32>
    %cst_79 = arith.constant 3.200000e+01 : f32
    %317 = vector.broadcast %cst_79 : f32 to vector<16x1xf32>
    %318 = arith.divf %316, %317 : vector<16x1xf32>
    %319 = vector.broadcast %318 : vector<16x1xf32> to vector<16x32xf32>
    %320 = arith.subf %310, %319 : vector<16x32xf32>
    %321 = arith.mulf %320, %320 : vector<16x32xf32>
    %cst_80 = arith.constant dense<0.000000e+00> : vector<16xf32>
    %322 = vector.multi_reduction <add>, %321, %cst_80 [1] : vector<16x32xf32> to vector<16xf32>
    %323 = vector.shape_cast %322 : vector<16xf32> to vector<16x1xf32>
    %cst_81 = arith.constant 3.200000e+01 : f32
    %324 = vector.broadcast %cst_81 : f32 to vector<16x1xf32>
    %325 = arith.divf %323, %324 : vector<16x1xf32>
    %cst_82 = arith.constant 9.99999974E-6 : f32
    %326 = vector.broadcast %cst_82 : f32 to vector<16x1xf32>
    %327 = arith.addf %325, %326 : vector<16x1xf32>
    %328 = math.rsqrt %327 : vector<16x1xf32>
    %329 = vector.broadcast %328 : vector<16x1xf32> to vector<16x32xf32>
    %330 = arith.mulf %320, %329 : vector<16x32xf32>
    %331 = vector.shape_cast %312 : vector<32xf32> to vector<1x32xf32>
    %332 = vector.broadcast %331 : vector<1x32xf32> to vector<16x32xf32>
    %333 = arith.mulf %330, %332 : vector<16x32xf32>
    %334 = vector.shape_cast %314 : vector<32xf32> to vector<1x32xf32>
    %335 = vector.broadcast %334 : vector<1x32xf32> to vector<16x32xf32>
    %336 = arith.addf %333, %335 : vector<16x32xf32>
    %337 = arith.truncf %336 : vector<16x32xf32> to vector<16x32xbf16>
    %cst_83 = arith.constant dense<0.000000e+00> : vector<16x64xf32>
    %338 = tpu.matmul %337, %208, %cst_83 {dimension_numbers = #tpu.dot_dimension_numbers<[1], [0], [0], [1], [0, 0, 1, 1], [], []>} : vector<16x32xbf16>, vector<32x64xbf16>, vector<16x64xf32> -> vector<16x64xf32>
    %339 = vector.extract_strided_slice %209 {offsets = [4, 0], sizes = [1, 64], strides = [1, 1]} : vector<8x128xf32> to vector<1x64xf32>
    %340 = vector.shape_cast %339 : vector<1x64xf32> to vector<64xf32>
    %341 = vector.shape_cast %340 : vector<64xf32> to vector<1x64xf32>
    %342 = vector.broadcast %341 : vector<1x64xf32> to vector<16x64xf32>
    %343 = arith.addf %338, %342 : vector<16x64xf32>
    %cst_84 = arith.constant 0.000000e+00 : f32
    %344 = vector.broadcast %cst_84 : f32 to vector<16x64xf32>
    %345 = arith.maximumf %343, %344 : vector<16x64xf32>
    %c1_85 = arith.constant 1 : index
    %c0_86 = arith.constant 0 : index
    %c0_87 = arith.constant 0 : index
    %346 = vector.load %arg3[%c1_85, %c0_86, %c0_87] : memref<2x64x32xbf16, #tpu.memory_space<vmem>>, vector<1x64x32xbf16>
    %347 = vector.shape_cast %346 : vector<1x64x32xbf16> to vector<64x32xbf16>
    %348 = arith.truncf %345 : vector<16x64xf32> to vector<16x64xbf16>
    %cst_88 = arith.constant dense<0.000000e+00> : vector<16x32xf32>
    %349 = tpu.matmul %348, %347, %cst_88 {dimension_numbers = #tpu.dot_dimension_numbers<[1], [0], [0], [1], [0, 0, 1, 1], [], []>} : vector<16x64xbf16>, vector<64x32xbf16>, vector<16x32xf32> -> vector<16x32xf32>
    %350 = vector.extract_strided_slice %209 {offsets = [5, 0], sizes = [1, 32], strides = [1, 1]} : vector<8x128xf32> to vector<1x32xf32>
    %351 = vector.shape_cast %350 : vector<1x32xf32> to vector<32xf32>
    %352 = vector.shape_cast %351 : vector<32xf32> to vector<1x32xf32>
    %353 = vector.broadcast %352 : vector<1x32xf32> to vector<16x32xf32>
    %354 = arith.addf %349, %353 : vector<16x32xf32>
    %355 = arith.addf %336, %354 : vector<16x32xf32>
    %356 = vector.extract_strided_slice %209 {offsets = [6, 0], sizes = [1, 32], strides = [1, 1]} : vector<8x128xf32> to vector<1x32xf32>
    %357 = vector.shape_cast %356 : vector<1x32xf32> to vector<32xf32>
    %358 = vector.extract_strided_slice %209 {offsets = [7, 0], sizes = [1, 32], strides = [1, 1]} : vector<8x128xf32> to vector<1x32xf32>
    %359 = vector.shape_cast %358 : vector<1x32xf32> to vector<32xf32>
    %cst_89 = arith.constant dense<0.000000e+00> : vector<16xf32>
    %360 = vector.multi_reduction <add>, %355, %cst_89 [1] : vector<16x32xf32> to vector<16xf32>
    %361 = vector.shape_cast %360 : vector<16xf32> to vector<16x1xf32>
    %cst_90 = arith.constant 3.200000e+01 : f32
    %362 = vector.broadcast %cst_90 : f32 to vector<16x1xf32>
    %363 = arith.divf %361, %362 : vector<16x1xf32>
    %364 = vector.broadcast %363 : vector<16x1xf32> to vector<16x32xf32>
    %365 = arith.subf %355, %364 : vector<16x32xf32>
    %366 = arith.mulf %365, %365 : vector<16x32xf32>
    %cst_91 = arith.constant dense<0.000000e+00> : vector<16xf32>
    %367 = vector.multi_reduction <add>, %366, %cst_91 [1] : vector<16x32xf32> to vector<16xf32>
    %368 = vector.shape_cast %367 : vector<16xf32> to vector<16x1xf32>
    %cst_92 = arith.constant 3.200000e+01 : f32
    %369 = vector.broadcast %cst_92 : f32 to vector<16x1xf32>
    %370 = arith.divf %368, %369 : vector<16x1xf32>
    %cst_93 = arith.constant 9.99999974E-6 : f32
    %371 = vector.broadcast %cst_93 : f32 to vector<16x1xf32>
    %372 = arith.addf %370, %371 : vector<16x1xf32>
    %373 = math.rsqrt %372 : vector<16x1xf32>
    %374 = vector.broadcast %373 : vector<16x1xf32> to vector<16x32xf32>
    %375 = arith.mulf %365, %374 : vector<16x32xf32>
    %376 = vector.shape_cast %357 : vector<32xf32> to vector<1x32xf32>
    %377 = vector.broadcast %376 : vector<1x32xf32> to vector<16x32xf32>
    %378 = arith.mulf %375, %377 : vector<16x32xf32>
    %379 = vector.shape_cast %359 : vector<32xf32> to vector<1x32xf32>
    %380 = vector.broadcast %379 : vector<1x32xf32> to vector<16x32xf32>
    %381 = arith.addf %378, %380 : vector<16x32xf32>
    %382 = vector.extract_strided_slice %381 {offsets = [7, 0], sizes = [1, 32], strides = [1, 1]} : vector<16x32xf32> to vector<1x32xf32>
    %383 = vector.extract_strided_slice %381 {offsets = [15, 0], sizes = [1, 32], strides = [1, 1]} : vector<16x32xf32> to vector<1x32xf32>
    %384 = tpu.concatenate %382, %383 in 0 : vector<1x32xf32>, vector<1x32xf32> -> vector<2x32xf32>
    %c0_94 = arith.constant 0 : index
    %c0_95 = arith.constant 0 : index
    %385 = vector.load %arg4[%c0_94, %c0_95] : memref<32x128xbf16, #tpu.memory_space<vmem>>, vector<32x128xbf16>
    %386 = arith.truncf %384 : vector<2x32xf32> to vector<2x32xbf16>
    %cst_96 = arith.constant dense<0.000000e+00> : vector<2x128xf32>
    %387 = tpu.matmul %386, %385, %cst_96 {dimension_numbers = #tpu.dot_dimension_numbers<[1], [0], [0], [1], [0, 0, 1, 1], [], []>} : vector<2x32xbf16>, vector<32x128xbf16>, vector<2x128xf32> -> vector<2x128xf32>
    %c16 = arith.constant 16 : index
    %c0_97 = arith.constant 0 : index
    %388 = vector.load %arg5[%c16, %c0_97] : memref<17x128xf32, #tpu.memory_space<vmem>>, vector<1x128xf32>
    %389 = vector.shape_cast %388 : vector<1x128xf32> to vector<128xf32>
    %390 = vector.shape_cast %389 : vector<128xf32> to vector<1x128xf32>
    %391 = vector.broadcast %390 : vector<1x128xf32> to vector<2x128xf32>
    %392 = arith.addf %387, %391 : vector<2x128xf32>
    %c0_98 = arith.constant 0 : index
    %c0_99 = arith.constant 0 : index
    %393 = vector.load %arg6[%c0_98, %c0_99] : memref<2x128xf32, #tpu.memory_space<vmem>>, vector<2x128xf32>
    tpu.vector_store %arg6[%c0_98, %c0_99], %392 {strides = array<i32>} : memref<2x128xf32, #tpu.memory_space<vmem>>, vector<2x128xf32>,
    return
  }
}

</mosaic_0001>

<bundles_post_ra>
// kernel: forward.1
= control target key start
LH: loop header
LB: loop body
LE: loop exit
PB: predicated region body
PF: predicated region fallthrough
CT: control target
= control target key end

     0   :  { %v1774_v2 = vmov 0   ;;  %s2404_s0 = inlined_call_operand.vmem [shape: s32[16,1], index: 0, kind: input, shape index: {}]   ;;  %s2405_s1 = inlined_call_operand.vmem [shape: f32[128,32], index: 1, kind: input, shape index: {}]   ;;  %s2406_s2 = inlined_call_operand.vmem [shape: bf16[2,32,192], index: 2, kind: input, shape index: {}]   ;;  %s2407_s3 = inlined_call_operand.vmem [shape: bf16[2,64,32], index: 3, kind: input, shape index: {}]   ;;  %s2408_s4 = inlined_call_operand.vmem [shape: bf16[32,128], index: 4, kind: input, shape index: {}]   ;;  %s2409_s5 = inlined_call_operand.vmem [shape: f32[17,128], index: 5, kind: input, shape index: {}]   ;;  %s2410_s6 = inlined_call_operand.hbm [shape: f32[2,128], index: 6, kind: output, shape index: {}]  }
   0x1   :  { %v30_v0 = vld [vmem:[%s2404_s0] sm:$0xff]  ;;  %v66_v1 = vld [vmem:[%s2405_s1 + $0x78] sm:$0xff]  ;;  %1634 = vset.pattern.permute.xlu0 %v1774_v2  ;;  %v65_v3 = vld [vmem:[%s2405_s1 + $0x70] sm:$0xff] }
   0x2   :  { %67 = vmatpush.msra.mxu0 %v66_v1  ;;  %33 = vperm.xlu0 %1634, %v30_v0   ;;  %v64_v4 = vld [vmem:[%s2405_s1 + $0x68] sm:$0xff]  ;;  %v63_v5 = vld [vmem:[%s2405_s1 + $0x60] sm:$0xff] }
   0x4   :  { %68 = vmatpush.msra.mxu0 %v65_v3 }
   0x6   :  { %69 = vmatpush.msra.mxu0 %v64_v4 }
   0x7   :  { %11 = vsyncpa [#allocation3], 0  ;;  %v62_v6 = vld [vmem:[%s2405_s1 + $0x58] sm:$0xff]  ;;  %v31_v7 = vld [vmem:[%s2404_s0 + $0x8] sm:$0xff]  ;;  %v25_v19 = vlaneseq  ;;  %v1775_v31 = vmov 0.0   ;;  %vm114_vm6 = vcmask 261120  }
   0x8   :  { %70 = vmatpush.msra.mxu0 %v63_v5  ;;  %v61_v8 = vld [vmem:[%s2405_s1 + $0x50] sm:$0xff]  ;;  %v60_v9 = vld [vmem:[%s2405_s1 + $0x48] sm:$0xff]  ;;  %v59_v10 = vld [vmem:[%s2405_s1 + $0x40] sm:$0xff]  ;;  %s1776_s17 = smov 96   ;;  %vm139_vm7 = vcmask 64512   ;;  %vm162_vm8 = vcmask 130048  }
   0x9   :  { %v58_v11 = vld [vmem:[%s2405_s1 + $0x38] sm:$0xff]  ;;  %v57_v12 = vld [vmem:[%s2405_s1 + $0x30] sm:$0xff]  ;;  %v56_v13 = vld [vmem:[%s2405_s1 + $0x28] sm:$0xff]  ;;  %v28_v20 = vshrl.u32 %v25_v19, 7  ;;  %v26_v21 = vand.u32 127, %v25_v19  ;;  %s1777_s18 = smov 64  }
   0xa   :  { %71 = vmatpush.msra.mxu0 %v62_v6  ;;  %36 = vperm.xlu0 %1634, %v31_v7   ;;  %v55_v14 = vld [vmem:[%s2405_s1 + $0x20] sm:$0xff]  ;;  %v54_v15 = vld [vmem:[%s2405_s1 + $0x18] sm:$0xff]  ;;  %v53_v16 = vld [vmem:[%s2405_s1 + $0x10] sm:$0xff]  ;;  %s1778_s0 = smov 56   ;;  %s1779_s19 = smov 88  }
   0xb   :  { %v52_v17 = vld [vmem:[%s2405_s1 + $0x8] sm:$0xff]  ;;  %v51_v18 = vld [vmem:[%s2405_s1] sm:$0xff]  ;;  %v90_v22 = vshra.s32 %v28_v20, 3  ;;  %v29_v23 = vadd.s32 8, %v28_v20  ;;  %v92_v25 = vshra.s32 %v26_v21, 3  ;;  %v1487_v28 = vadd.s32 4294967232, %v26_v21 }
   0xc   :  { %72 = vmatpush.msra.mxu0 %v61_v8  ;;  %v41_v29 = vand.u32 7, %v28_v20  ;;  %v1494_v40 = vld [vmem:[%s2406_s2 + $0x10] sm:$0xf]  ;;  %v1600_v41 = vld [vmem:[%s2406_s2 + $0x14] sm:$0xf0]  ;;  %v1918_v49 = vld [vmem:[%s2409_s5] sm:$0xff] }
   0xd   :  { %v91_v24 = vshra.s32 %v29_v23, 3  ;;  %vm1882_vm0 = vcmp.eq.s32.totalorder %v90_v22, %v92_v25  ;;  %v42_v33 = vand.u32 7, %v29_v23  ;;  %v1896_v42 = vor.u32 %v1600_v41, %v1494_v40  ;;  %v1490_v43 = vld [vmem:[%s2406_s2] sm:$0xf]  ;;  %v1598_v44 = vld [vmem:[%s2406_s2 + $0x4] sm:$0xf0] }
   0xe   :  { %73 = vmatpush.msra.mxu0 %v60_v9  ;;  %vm43_vm2 = vcmp.eq.s32.totalorder %v1487_v28, %v41_v29  ;;  %v1905_v45 = vor.u32 %v1598_v44, %v1490_v43  ;;  %v101_v51 = vperm.slane %v1918_v49, 0  ;;  %s1780_s20 = smov 72   ;;  %s1781_s21 = smov 120  }
   0xf   :  { %vm1886_vm1 = vcmp.eq.s32.totalorder %v91_v24, %v92_v25  ;;  %v47_v32 = vsel %vm43_vm2, 1.0, %v1775_v31  ;;  %vm44_vm4 = vcmp.eq.s32.totalorder %v1487_v28, %v42_v33  ;;  %124 = vmatpush.bf16.msra.mxu1 %v1896_v42  ;;  %s1782_s22 = smov 80   ;;  %s1783_s23 = smov 104  }
  0x10   :  { %74 = vmatpush.msra.mxu0 %v59_v10  ;;  %v48_v37 = vsel %vm44_vm4, 1.0, %v1775_v31  ;;  %s1784_s24 = smov 112   ;;  %s1785_s25 = smov 40  }
  0x11   :  { %s1786_s26 = smov 48   ;;  %s1787_s27 = smov 8  }
  0x12   :  { %75 = vmatpush.msra.mxu0 %v58_v11  ;;  %s1788_s28 = smov 32   ;;  %s1789_s29 = smov 16  }
  0x13   :  { %125 = vmatpush.bf16.msra.mxu1 %v1905_v45  ;;  %s1790_s30 = smov 24   ;;  %s1792_s14 = smov [#allocation2]  }
  0x14   :  { %76 = vmatpush.msra.mxu0 %v57_v12  ;;  %s1476_s15 = sshll.u32 %s1792_s14, 4  ;;  %s1478_s1 = sshll.u32 %s2410_s6, 4  ;;  %s1477_s15 = int_to_ptr.vmem [resolvable:$true] %s1476_s15  ;;  %s1479_s1 = int_to_ptr.hbm [resolvable:$true] %s1478_s1 }
  0x16   :  { %77 = vmatpush.msra.mxu0 %v56_v13 }
  0x18   :  { %78 = vmatpush.msra.mxu0 %v55_v14 }
  0x1a   :  { %79 = vmatpush.msra.mxu0 %v54_v15 }
  0x1c   :  { %80 = vmatpush.msra.mxu0 %v53_v16 }
  0x1e   :  { %81 = vmatpush.msra.mxu0 %v52_v17 }
  0x20   :  { %82 = vmatpush.msra.mxu0 %v51_v18 }
  0x74   :  { %v34_v30 = vpop.permute.xlu0 %33 }
  0x75   :  { %vm38_vm3 = vcmp.eq.s32.totalorder %v26_v21, %v34_v30 }
  0x76   :  { %v45_v34 = vsel %vm38_vm3, 5.656854, %v1775_v31 }
  0x77   :  { %v49_v35 = vadd.f32 %v47_v32, %v45_v34 }
  0x79   :  { %83 = vmatmul.f32.vlgmr.msra.gmra.mxu0 %v49_v35 }
  0x7c   :  { %v37_v36 = vpop.permute.xlu0 %36 }
  0x7d   :  { %vm39_vm5 = vcmp.eq.s32.totalorder %v26_v21, %v37_v36 }
  0x7e   :  { %v46_v38 = vsel %vm39_vm5, 5.656854, %v1775_v31 }
  0x7f   :  { %v50_v39 = vadd.f32 %v48_v37, %v46_v38 }
  0x81   :  { %86 = vmatmul.f32.gmra.mxu0 %v50_v39 }
  0xf6   :  { %v1908_v46 = vpop.f32.mrf.mxu0 }
  0xfe   :  { %v1910_v47 = vpop.f32.mrf.mxu0 }
  0xff   :  { %v100_v48 = vpack.c.bf16 %v1910_v47, %v1908_v46 }
 0x101   :  { %1496 = vmatmul.msk.bf16.vlgmr.msra.gmra.mxu1 %vm114_vm6, %v100_v48 }
 0x17e   :  { %v127_v50 = vpop.f32.mrf.mxu1 }
 0x17f   :  { %v128_v52 = vadd.f32 %v127_v50, %v101_v51 }
 0x181   :  { %v132_v55 = vmul.f32 0.35355338, %v128_v52 }
 0x186   :  { %v129_v53 = vpop.f32.mrf.mxu1 }
 0x187   :  { %v130_v54 = vadd.f32 %v129_v53, %v101_v51 }
 0x189   :  { %v133_v56 = vmul.f32 0.35355338, %v130_v54  ;;  %v1921_v57 = vpack.c.bf16 %v130_v54, %v128_v52 }
 0x18b   :  { %v1923_v58 = vpack.c.bf16 %v133_v56, %v132_v55  ;;  %137 = vrot.lane.b32.xlu1 %v1921_v57, %s1776_s17 }
 0x1fd   :  { %v138_v59 = vpop.permute.xlu1 %137 }
 0x1fe   :  { %v144_v60 = vsel %vm139_vm7, %v138_v59, 0 }
 0x1ff   :  { %153 = vmatpush.bf16.xpose.msra.mxu2 %v144_v60 }
 0x206   :  { %1497 = vmatmul.msk.bf16.vlgmr.msra.gmra.mxu2 %vm139_vm7, %v1923_v58 }
 0x289   :  { %v155_v61 = vpop.f32.mrf.mxu2 }
 0x28a   :  { %v160_v62 = vsel %vm1882_vm0, %v155_v61, -1e+30 }
 0x28b   :  { %v163_v63 = vsel %vm162_vm8, %v160_v62, -inf }
 0x28c   :  { %164 = vmax.xlane.f32.xlu1 %v163_v63 }
 0x291   :  { %v157_v0 = vpop.f32.mrf.mxu2 }
 0x292   :  { %v161_v1 = vsel %vm1886_vm1, %v157_v0, -1e+30 }
 0x293   :  { %v166_v2 = vsel %vm162_vm8, %v161_v1, -inf }
 0x294   :  { %167 = vmax.xlane.f32.xlu2 %v166_v2 }
 0x2ff   :  { %v165_v3 = vpop.xlane.xlu1 %164 }
 0x300   :  { %v169_v4 = vsub.f32 %v160_v62, %v165_v3 }
 0x302   :  { %v171_v5 = vmul.f32 1.442695, %v169_v4 }
 0x304   :  { %1666 = vpow2.f32 %v171_v5 }
 0x307   :  { %v168_v6 = vpop.xlane.xlu2 %167 }
 0x308   :  { %v170_v7 = vsub.f32 %v161_v1, %v168_v6 }
 0x30a   :  { %v1667_v8 = vpop.eup %1666  ;;  %v173_v9 = vmul.f32 1.442695, %v170_v7 }
 0x30b   :  { %v175_v10 = vsel %vm162_vm8, %v1667_v8, 0.0 }
 0x30c   :  { %1668 = vpow2.f32 %v173_v9  ;;  %176 = vadd.xlane.f32.xlu2 %v175_v10 }
 0x312   :  { %v1669_v11 = vpop.eup %1668 }
 0x313   :  { %v178_v12 = vsel %vm162_vm8, %v1669_v11, 0.0 }
 0x314   :  { %179 = vadd.xlane.f32.xlu0 %v178_v12 }
 0x324   :  { %212 = vrot.lane.b32.xlu2 %v1921_v57, %s1777_s18 }
 0x328   :  { %308 = vrot.lane.b32.xlu0 %v1921_v57, %s1778_s0 }
 0x32c   :  { %235 = vrot.lane.b32.xlu2 %v1921_v57, %s1779_s19 }
 0x330   :  { %425 = vrot.lane.b32.xlu0 %v1921_v57, %s1780_s20 }
 0x334   :  { %233 = vrot.lane.b32.xlu2 %v1923_v58, %s1781_s21 }
 0x37f   :  { %v177_v13 = vpop.xlane.xlu2 %176 }
 0x380   :  { %1670 = vrcp.f32 %v177_v13  ;;  %v192_v24 = vand.u32 2147483648, %v177_v13  ;;  %vm186_vm10 = vweird.f32 %v177_v13  ;;  %v190_v28 = vand.u32 2147483647, %v177_v13 }
 0x382   :  { %v193_v34 = vor.u32 1.1754944e-38, %v192_v24  ;;  %vm191_vm13 = vcmp.eq.f32.partialorder %v190_v28, 8.507059e+37 }
 0x386   :  { %v1671_v14 = vpop.eup %1670 }
 0x387   :  { %v182_v15 = vmul.f32 %v1671_v14, %v177_v13  ;;  %v180_v16 = vpop.xlane.xlu0 %179  ;;  %v213_v17 = vpop.permute.xlu2 %212  ;;  %vm187_vm9 = vweird.f32 %v1671_v14 }
 0x388   :  { %1672 = vrcp.f32 %v180_v16  ;;  %225 = vmatpush.bf16.msra.mxu3 %v213_v17  ;;  %vm188_vm11 = vmor %vm186_vm10, %vm187_vm9  ;;  %v207_v30 = vand.u32 2147483648, %v180_v16  ;;  %v205_v32 = vand.u32 2147483647, %v180_v16  ;;  %vm201_vm14 = vweird.f32 %v180_v16 }
 0x389   :  { %v183_v18 = vsub.f32 1.0, %v182_v15 }
 0x38a   :  { %v208_v36 = vor.u32 1.1754944e-38, %v207_v30  ;;  %vm206_vm2 = vcmp.eq.f32.partialorder %v205_v32, 8.507059e+37 }
 0x38b   :  { %v184_v19 = vmul.f32 %v1671_v14, %v183_v18 }
 0x38d   :  { %v185_v21 = vadd.f32 %v1671_v14, %v184_v19 }
 0x38e   :  { %v1673_v20 = vpop.eup %1672 }
 0x38f   :  { %v197_v22 = vmul.f32 %v1673_v20, %v180_v16  ;;  %v236_v23 = vpop.permute.xlu2 %235  ;;  %vm202_vm12 = vweird.f32 %v1673_v20  ;;  %v189_v33 = vsel %vm188_vm11, %v1671_v14, %v185_v21 }
 0x390   :  { %v241_v25 = vsel %vm139_vm7, %v236_v23, 0  ;;  %vm203_vm15 = vmor %vm201_vm14, %vm202_vm12  ;;  %v194_v37 = vsel %vm191_vm13, %v193_v34, %v189_v33 }
 0x391   :  { %v198_v29 = vsub.f32 1.0, %v197_v22  ;;  %250 = vmatpush.bf16.xpose.msrb.mxu3 %v241_v25  ;;  %v195_v40 = vmul.f32 %v1667_v8, %v194_v37 }
 0x393   :  { %v199_v31 = vmul.f32 %v1673_v20, %v198_v29 }
 0x395   :  { %v200_v35 = vadd.f32 %v1673_v20, %v199_v31 }
 0x397   :  { %v204_v38 = vsel %vm203_vm15, %v1673_v20, %v200_v35  ;;  %v234_v51 = vpop.permute.xlu2 %233 }
 0x398   :  { %v209_v39 = vsel %vm206_vm2, %v208_v36, %v204_v38 }
 0x399   :  { %v210_v41 = vmul.f32 %v1669_v11, %v209_v39 }
 0x39a   :  { %v309_v43 = vpop.permute.xlu0 %308 }
 0x39b   :  { %321 = vmatpush.bf16.msrb.mxu1 %v309_v43  ;;  %v211_v44 = vpack.c.bf16 %v210_v41, %v195_v40 }
 0x39d   :  { %1498 = vmatmul.msk.bf16.vlgmr.msra.gmra.mxu3 %vm162_vm8, %v211_v44 }
 0x3a2   :  { %v426_v48 = vpop.permute.xlu0 %425 }
 0x3a3   :  { %v431_v50 = vsel %vm139_vm7, %v426_v48, 0 }
 0x3a4   :  { %440 = vmatpush.bf16.xpose.msra.mxu1 %v431_v50 }
 0x3ad   :  { %1499 = vmatmul.msk.bf16.vlgmr.msrb.gmra.mxu3 %vm139_vm7, %v234_v51 }
 0x420   :  { %v1952_v52 = vpop.f32.mrf.mxu3 }
 0x428   :  { %v1954_v53 = vpop.f32.mrf.mxu3 }
 0x430   :  { %v252_v54 = vpop.f32.mrf.mxu3 }
 0x431   :  { %v257_v55 = vsel %vm1882_vm0, %v252_v54, -1e+30 }
 0x432   :  { %v259_v56 = vsel %vm162_vm8, %v257_v55, -inf }
 0x433   :  { %260 = vmax.xlane.f32.xlu1 %v259_v56 }
 0x438   :  { %v254_v59 = vpop.f32.mrf.mxu3 }
 0x439   :  { %v258_v60 = vsel %vm1886_vm1, %v254_v59, -1e+30 }
 0x43a   :  { %v262_v61 = vsel %vm162_vm8, %v258_v60, -inf }
 0x43b   :  { %263 = vmax.xlane.f32.xlu2 %v262_v61 }
 0x44c   :  { %330 = vrot.lane.b32.xlu1 %v1921_v57, %s1782_s22 }
 0x4a6   :  { %v261_v62 = vpop.xlane.xlu1 %260 }
 0x4a7   :  { %v265_v63 = vsub.f32 %v257_v55, %v261_v62 }
 0x4a9   :  { %v267_v0 = vmul.f32 1.442695, %v265_v63 }
 0x4ab   :  { %1674 = vpow2.f32 %v267_v0 }
 0x4ae   :  { %v264_v1 = vpop.xlane.xlu2 %263 }
 0x4af   :  { %v266_v2 = vsub.f32 %v258_v60, %v264_v1 }
 0x4b1   :  { %v1675_v3 = vpop.eup %1674  ;;  %v269_v4 = vmul.f32 1.442695, %v266_v2 }
 0x4b2   :  { %v271_v5 = vsel %vm162_vm8, %v1675_v3, 0.0 }
 0x4b3   :  { %1676 = vpow2.f32 %v269_v4  ;;  %272 = vadd.xlane.f32.xlu0 %v271_v5 }
 0x4b9   :  { %v1677_v6 = vpop.eup %1676 }
 0x4ba   :  { %v274_v7 = vsel %vm162_vm8, %v1677_v6, 0.0 }
 0x4bb   :  { %275 = vadd.xlane.f32.xlu1 %v274_v7 }
 0x4be   :  { %v331_v8 = vpop.permute.xlu1 %330 }
 0x4bf   :  { %v336_v9 = vsel %vm139_vm7, %v331_v8, 0 }
 0x4c0   :  { %345 = vmatpush.bf16.xpose.msrb.mxu2 %v336_v9 }
 0x4c7   :  { %423 = vrot.lane.b32.xlu0 %v1923_v58, %s1783_s23 }
 0x4d4   :  { %328 = vrot.lane.b32.xlu1 %v1923_v58, %s1784_s24 }
 0x526   :  { %v273_v10 = vpop.xlane.xlu0 %272 }
 0x527   :  { %1678 = vrcp.f32 %v273_v10  ;;  %v288_v19 = vand.u32 2147483648, %v273_v10  ;;  %vm282_vm4 = vweird.f32 %v273_v10  ;;  %v286_v20 = vand.u32 2147483647, %v273_v10 }
 0x529   :  { %v289_v25 = vor.u32 1.1754944e-38, %v288_v19  ;;  %vm287_vm10 = vcmp.eq.f32.partialorder %v286_v20, 8.507059e+37 }
 0x52d   :  { %v1679_v11 = vpop.eup %1678 }
 0x52e   :  { %v278_v12 = vmul.f32 %v1679_v11, %v273_v10  ;;  %v276_v13 = vpop.xlane.xlu1 %275  ;;  %vm283_vm3 = vweird.f32 %v1679_v11 }
 0x52f   :  { %1680 = vrcp.f32 %v276_v13  ;;  %vm284_vm5 = vmor %vm282_vm4, %vm283_vm3  ;;  %v303_v22 = vand.u32 2147483648, %v276_v13  ;;  %v301_v24 = vand.u32 2147483647, %v276_v13  ;;  %vm297_vm11 = vweird.f32 %v276_v13 }
 0x530   :  { %v279_v14 = vsub.f32 1.0, %v278_v12 }
 0x531   :  { %v304_v29 = vor.u32 1.1754944e-38, %v303_v22  ;;  %vm302_vm13 = vcmp.eq.f32.partialorder %v301_v24, 8.507059e+37 }
 0x532   :  { %v280_v15 = vmul.f32 %v1679_v11, %v279_v14 }
 0x534   :  { %v281_v17 = vadd.f32 %v1679_v11, %v280_v15 }
 0x535   :  { %v1681_v16 = vpop.eup %1680 }
 0x536   :  { %v293_v18 = vmul.f32 %v1681_v16, %v276_v13  ;;  %v285_v23 = vsel %vm284_vm5, %v1679_v11, %v281_v17  ;;  %vm298_vm9 = vweird.f32 %v1681_v16 }
 0x537   :  { %vm299_vm12 = vmor %vm297_vm11, %vm298_vm9  ;;  %v290_v30 = vsel %vm287_vm10, %v289_v25, %v285_v23 }
 0x538   :  { %v294_v21 = vsub.f32 1.0, %v293_v18  ;;  %v291_v33 = vmul.f32 %v1675_v3, %v290_v30 }
 0x539   :  { %v424_v37 = vpop.permute.xlu0 %423 }
 0x53a   :  { %v295_v58 = vmul.f32 %v1681_v16, %v294_v21 }
 0x53c   :  { %v296_v28 = vadd.f32 %v1681_v16, %v295_v58 }
 0x53e   :  { %v300_v31 = vsel %vm299_vm12, %v1681_v16, %v296_v28 }
 0x53f   :  { %v305_v32 = vsel %vm302_vm13, %v304_v29, %v300_v31 }
 0x540   :  { %v306_v34 = vmul.f32 %v1677_v6, %v305_v32 }
 0x542   :  { %v307_v35 = vpack.c.bf16 %v306_v34, %v291_v33 }
 0x544   :  { %1500 = vmatmul.msk.bf16.vlgmr.msrb.gmra.mxu1 %vm162_vm8, %v307_v35 }
 0x546   :  { %v329_v36 = vpop.permute.xlu1 %328 }
 0x547   :  { %1501 = vmatmul.msk.bf16.vlgmr.msrb.gmra.mxu2 %vm139_vm7, %v329_v36 }
 0x554   :  { %1503 = vmatmul.msk.bf16.vlgmr.msra.gmra.mxu1 %vm139_vm7, %v424_v37 }
 0x5c1   :  { %v323_v38 = vpop.f32.mrf.mxu1 }
 0x5c9   :  { %v325_v39 = vpop.f32.mrf.mxu1 }
 0x5ca   :  { %v347_v40 = vpop.f32.mrf.mxu2  ;;  %v1635_v61 = vpack.i.bf16 %v325_v39, %v323_v38 }
 0x5cb   :  { %v352_v41 = vsel %vm1882_vm0, %v347_v40, -1e+30 }
 0x5cc   :  { %v354_v43 = vsel %vm162_vm8, %v352_v41, -inf }
 0x5cd   :  { %355 = vmax.xlane.f32.xlu2 %v354_v43 }
 0x5d1   :  { %v442_v44 = vpop.f32.mrf.mxu1 }
 0x5d2   :  { %v447_v48 = vsel %vm1882_vm0, %v442_v44, -1e+30  ;;  %v349_v50 = vpop.f32.mrf.mxu2 }
 0x5d3   :  { %v353_v51 = vsel %vm1886_vm1, %v349_v50, -1e+30  ;;  %v449_v54 = vsel %vm162_vm8, %v447_v48, -inf }
 0x5d4   :  { %450 = vmax.xlane.f32.xlu0 %v449_v54  ;;  %v357_v55 = vsel %vm162_vm8, %v353_v51, -inf }
 0x5d5   :  { %358 = vmax.xlane.f32.xlu1 %v357_v55 }
 0x5d9   :  { %v444_v56 = vpop.f32.mrf.mxu1 }
 0x5da   :  { %v448_v59 = vsel %vm1886_vm1, %v444_v56, -1e+30 }
 0x5db   :  { %v452_v60 = vsel %vm162_vm8, %v448_v59, -inf }
 0x5dc   :  { %453 = vmax.xlane.f32.xlu2 %v452_v60 }
 0x5e8   :  { %498 = vrot.lane.b32.xlu0 %v1921_v57, %s1785_s25 }
 0x5ee   :  { %403 = vrot.lane.b32.xlu1 %v1921_v57, %s1786_s26 }
 0x5f0   :  { %1636 = vrot.lane.b32.xlu0 %v1635_v61, %s1787_s27 }
 0x5f8   :  { %551 = vrot.lane.b32.xlu0 %v1905_v45, %s1788_s28 }
 0x640   :  { %v356_v62 = vpop.xlane.xlu2 %355 }
 0x641   :  { %v360_v63 = vsub.f32 %v352_v41, %v356_v62 }
 0x643   :  { %v362_v0 = vmul.f32 1.442695, %v360_v63 }
 0x645   :  { %1682 = vpow2.f32 %v362_v0 }
 0x647   :  { %v451_v1 = vpop.xlane.xlu0 %450 }
 0x648   :  { %v359_v2 = vpop.xlane.xlu1 %358  ;;  %v455_v5 = vsub.f32 %v447_v48, %v451_v1 }
 0x649   :  { %v361_v3 = vsub.f32 %v353_v51, %v359_v2 }
 0x64a   :  { %v457_v57 = vmul.f32 1.442695, %v455_v5 }
 0x64b   :  { %v1991_v4 = vpop.eup %1682  ;;  %v364_v6 = vmul.f32 1.442695, %v361_v3 }
 0x64c   :  { %v366_v7 = vsel %vm162_vm8, %v1991_v4, 0.0 }
 0x64d   :  { %1684 = vpow2.f32 %v364_v6  ;;  %367 = vadd.xlane.f32.xlu2 %v366_v7 }
 0x64e   :  { %1686 = vpow2.f32 %v457_v57 }
 0x64f   :  { %v454_v8 = vpop.xlane.xlu2 %453 }
 0x650   :  { %v456_v10 = vsub.f32 %v448_v59, %v454_v8 }
 0x652   :  { %v459_v12 = vmul.f32 1.442695, %v456_v10 }
 0x653   :  { %v1685_v9 = vpop.eup %1684 }
 0x654   :  { %v369_v11 = vsel %vm162_vm8, %v1685_v9, 0.0  ;;  %v1996_v13 = vpop.eup %1686  ;;  %1688 = vpow2.f32 %v459_v12 }
 0x655   :  { %370 = vadd.xlane.f32.xlu2 %v369_v11  ;;  %v461_v15 = vsel %vm162_vm8, %v1996_v13, 0.0 }
 0x65a   :  { %v499_v14 = vpop.permute.xlu0 %498  ;;  %v2000_v17 = vpop.eup %1688 }
 0x65b   :  { %511 = vmatpush.bf16.msra.mxu2 %v499_v14  ;;  %v464_v18 = vsel %vm162_vm8, %v2000_v17, 0.0 }
 0x65d   :  { %462 = vadd.xlane.f32.xlu2 %v461_v15 }
 0x660   :  { %v404_v16 = vpop.permute.xlu1 %403 }
 0x661   :  { %416 = vmatpush.bf16.msra.mxu3 %v404_v16 }
 0x662   :  { %v1637_v45 = vpop.permute.xlu0 %1636 }
 0x665   :  { %465 = vadd.xlane.f32.xlu2 %v464_v18 }
 0x67d   :  { %553 = vrot.lane.b32.xlu2 %v1896_v42, %s1788_s28  ;;  %v1639_v42 = vunpack.i.h.bf16 %v1637_v45 }
 0x6c0   :  { %v368_v19 = vpop.xlane.xlu2 %367 }
 0x6c1   :  { %1690 = vrcp.f32 %v368_v19  ;;  %v383_v30 = vand.u32 2147483648, %v368_v19  ;;  %vm377_vm15 = vweird.f32 %v368_v19  ;;  %v381_v31 = vand.u32 2147483647, %v368_v19 }
 0x6c3   :  { %v384_v37 = vor.u32 1.1754944e-38, %v383_v30  ;;  %vm382_vm4 = vcmp.eq.f32.partialorder %v381_v31, 8.507059e+37 }
 0x6c7   :  { %v1691_v20 = vpop.eup %1690 }
 0x6c8   :  { %v373_v21 = vmul.f32 %v1691_v20, %v368_v19  ;;  %v371_v22 = vpop.xlane.xlu2 %370  ;;  %vm378_vm14 = vweird.f32 %v1691_v20 }
 0x6c9   :  { %1692 = vrcp.f32 %v371_v22  ;;  %vm379_vm2 = vmor %vm377_vm15, %vm378_vm14  ;;  %v398_v33 = vand.u32 2147483648, %v371_v22  ;;  %v396_v36 = vand.u32 2147483647, %v371_v22  ;;  %vm392_vm5 = vweird.f32 %v371_v22 }
 0x6ca   :  { %v374_v23 = vsub.f32 1.0, %v373_v21  ;;  %v552_v21 = vpop.permute.xlu0 %551 }
 0x6cb   :  { %v399_v41 = vor.u32 1.1754944e-38, %v398_v33  ;;  %vm397_vm10 = vcmp.eq.f32.partialorder %v396_v36, 8.507059e+37 }
 0x6cc   :  { %v375_v58 = vmul.f32 %v1691_v20, %v374_v23 }
 0x6ce   :  { %v376_v25 = vadd.f32 %v1691_v20, %v375_v58 }
 0x6cf   :  { %v1693_v24 = vpop.eup %1692 }
 0x6d0   :  { %v388_v28 = vmul.f32 %v1693_v24, %v371_v22  ;;  %v463_v29 = vpop.xlane.xlu2 %462  ;;  %v380_v34 = vsel %vm379_vm2, %v1691_v20, %v376_v25  ;;  %vm393_vm3 = vweird.f32 %v1693_v24  ;;  %v1638_v22 = vunpack.i.l.bf16 %v1637_v45 }
 0x6d1   :  { %1694 = vrcp.f32 %v463_v29  ;;  %v385_v40 = vsel %vm382_vm4, %v384_v37, %v380_v34  ;;  %vm394_vm9 = vmor %vm392_vm5, %vm393_vm3  ;;  %v478_v63 = vand.u32 2147483648, %v463_v29  ;;  %vm472_vm12 = vweird.f32 %v463_v29 }
 0x6d2   :  { %v389_v32 = vsub.f32 1.0, %v388_v28  ;;  %v386_v51 = vmul.f32 %v1991_v4, %v385_v40  ;;  %v476_v0 = vand.u32 2147483647, %v463_v29  ;;  %vm546_vm5 = vcmask 195584  }
 0x6d3   :  { %v479_v6 = vor.u32 1.1754944e-38, %v478_v63  ;;  %v543_v28 = vsel %vm139_vm7, %v1954_v53, %v1639_v42  ;;  %v550_v37 = vperm.slane %v1918_v49, 1 }
 0x6d4   :  { %v390_v35 = vmul.f32 %v1693_v24, %v389_v32  ;;  %vm477_vm15 = vcmp.eq.f32.partialorder %v476_v0, 8.507059e+37 }
 0x6d6   :  { %v391_v38 = vadd.f32 %v1693_v24, %v390_v35 }
 0x6d7   :  { %v1695_v39 = vpop.eup %1694 }
 0x6d8   :  { %v395_v43 = vsel %vm394_vm9, %v1693_v24, %v391_v38  ;;  %v468_v44 = vmul.f32 %v1695_v39, %v463_v29  ;;  %v466_v48 = vpop.xlane.xlu2 %465  ;;  %vm473_vm11 = vweird.f32 %v1695_v39  ;;  %v542_v29 = vsel %vm139_vm7, %v1952_v52, %v1638_v22 }
 0x6d9   :  { %v400_v50 = vsel %vm397_vm10, %v399_v41, %v395_v43  ;;  %1696 = vrcp.f32 %v466_v48  ;;  %vm474_vm13 = vmor %vm472_vm12, %vm473_vm11  ;;  %v493_v2 = vand.u32 2147483648, %v466_v48  ;;  %v491_v4 = vand.u32 2147483647, %v466_v48 }
 0x6da   :  { %v401_v54 = vmul.f32 %v1685_v9, %v400_v50  ;;  %v469_v55 = vsub.f32 1.0, %v468_v44  ;;  %vm487_vm2 = vweird.f32 %v466_v48 }
 0x6db   :  { %v494_v8 = vor.u32 1.1754944e-38, %v493_v2  ;;  %vm492_vm4 = vcmp.eq.f32.partialorder %v491_v4, 8.507059e+37  ;;  %v1510_v4 = vld [vmem:[%s2406_s2 + $0x18] sm:$0xf0] }
 0x6dc   :  { %v470_v56 = vmul.f32 %v1695_v39, %v469_v55  ;;  %v402_v59 = vpack.c.bf16 %v401_v54, %v386_v51 }
 0x6de   :  { %1502 = vmatmul.msk.bf16.vlgmr.msra.gmra.mxu3 %vm162_vm8, %v402_v59  ;;  %v471_v61 = vadd.f32 %v1695_v39, %v470_v56 }
 0x6df   :  { %v1697_v60 = vpop.eup %1696 }
 0x6e0   :  { %v483_v62 = vmul.f32 %v1697_v60, %v466_v48  ;;  %v475_v3 = vsel %vm474_vm13, %v1695_v39, %v471_v61  ;;  %vm488_vm14 = vweird.f32 %v1697_v60  ;;  %v554_v15 = vpop.permute.xlu2 %553  ;;  %v1791_v48 = vmov 32.0  }
 0x6e1   :  { %v480_v57 = vsel %vm477_vm15, %v479_v6, %v475_v3  ;;  %vm489_vm3 = vmor %vm487_vm2, %vm488_vm14  ;;  %566 = vmatpush.bf16.msrb.mxu0 %v554_v15  ;;  %1698 = vrcp.f32 %v1791_v48  ;;  %vm696_vm2 = vcmask 523264  }
 0x6e2   :  { %v484_v1 = vsub.f32 1.0, %v483_v62  ;;  %v481_v11 = vmul.f32 %v1996_v13, %v480_v57 }
 0x6e4   :  { %v485_v5 = vmul.f32 %v1697_v60, %v484_v1 }
 0x6e5   :  { %567 = vmatpush.bf16.msrb.mxu0 %v552_v21 }
 0x6e6   :  { %v486_v7 = vadd.f32 %v1697_v60, %v485_v5  ;;  %v1599_v5 = vld [vmem:[%s2406_s2 + $0x14] sm:$0xf] }
 0x6e7   :  { %v1699_v50 = vpop.eup %1698  ;;  %v1513_v6 = vor.u32 %v1599_v5, %v1510_v4 }
 0x6e8   :  { %v490_v9 = vsel %vm489_vm3, %v1697_v60, %v486_v7  ;;  %v583_v51 = vmul.f32 32.0, %v1699_v50  ;;  %vm587_vm9 = vweird.f32 %v1699_v50 }
 0x6e9   :  { %v495_v10 = vsel %vm492_vm4, %v494_v8, %v490_v9  ;;  %652 = vmatpush.bf16.msrb.mxu3 %v1513_v6  ;;  %v1597_v8 = vld [vmem:[%s2406_s2 + $0x4] sm:$0xf]  ;;  %v1506_v9 = vld [vmem:[%s2406_s2 + $0x8] sm:$0xf0] }
 0x6ea   :  { %v496_v12 = vmul.f32 %v2000_v17, %v495_v10  ;;  %v584_v54 = vsub.f32 1.0, %v583_v51 }
 0x6ec   :  { %v497_v14 = vpack.c.bf16 %v496_v12, %v481_v11  ;;  %v585_v55 = vmul.f32 %v1699_v50, %v584_v54  ;;  %v1509_v11 = vor.u32 %v1597_v8, %v1506_v9  ;;  %v671_v54 = vperm.slane %v1918_v49, 5  ;;  %v1542_v9 = vld [vmem:[%s2406_s2 + $0x30] sm:$0xf] }
 0x6ee   :  { %1504 = vmatmul.msk.bf16.vlgmr.msra.gmra.mxu2 %vm162_vm8, %v497_v14  ;;  %v586_v56 = vadd.f32 %v1699_v50, %v585_v55  ;;  %653 = vmatpush.bf16.msrb.mxu3 %v1509_v11 }
 0x6f0   :  { %v2029_v59 = vsel %vm587_vm9, %v1699_v50, %v586_v56 }
 0x761   :  { %v418_v16 = vpop.f32.mrf.mxu3 }
 0x769   :  { %v420_v18 = vpop.f32.mrf.mxu3 }
 0x76a   :  { %v1640_v19 = vpack.i.bf16 %v420_v18, %v418_v16 }
 0x76c   :  { %1641 = vrot.lane.b32.xlu1 %v1640_v19, %s1789_s29 }
 0x771   :  { %v513_v13 = vpop.f32.mrf.mxu2 }
 0x779   :  { %v515_v17 = vpop.f32.mrf.mxu2 }
 0x77a   :  { %v1645_v20 = vpack.i.bf16 %v515_v17, %v513_v13 }
 0x77c   :  { %1646 = vrot.lane.b32.xlu2 %v1645_v20, %s1790_s30 }
 0x7d6   :  { %v1647_v23 = vpop.permute.xlu2 %1646 }
 0x7d7   :  { %v1649_v30 = vunpack.i.h.bf16 %v1647_v23  ;;  %v1648_v31 = vunpack.i.l.bf16 %v1647_v23 }
 0x7de   :  { %v1642_v58 = vpop.permute.xlu1 %1641 }
 0x7df   :  { %v1644_v24 = vunpack.i.h.bf16 %v1642_v58  ;;  %v1643_v25 = vunpack.i.l.bf16 %v1642_v58 }
 0x7e1   :  { %v545_v32 = vsel %vm162_vm8, %v543_v28, %v1644_v24  ;;  %v544_v33 = vsel %vm162_vm8, %v542_v29, %v1643_v25  ;;  %v627_v24 = vperm.slane %v1918_v49, 2 }
 0x7e2   :  { %v547_v34 = vsel %vm546_vm5, %v544_v33, %v1648_v31  ;;  %v548_v35 = vsel %vm546_vm5, %v545_v32, %v1649_v30  ;;  %v630_v30 = vperm.slane %v1918_v49, 3 }
 0x7e3   :  { %v549_v36 = vpack.c.bf16 %v548_v35, %v547_v34 }
 0x7e5   :  { %1505 = vmatmul.msk.bf16.vlgmr.msrb.gmra.mxu0 %vm114_vm6, %v549_v36 }
 0x862   :  { %v569_v38 = vpop.f32.mrf.mxu0 }
 0x863   :  { %v570_v53 = vadd.f32 %v569_v38, %v550_v37  ;;  %v1603_v38 = vld [vmem:[%s2407_s3 + $0x10] sm:$0xff] }
 0x865   :  { %v574_v39 = vadd.f32 %v570_v53, %v1908_v46  ;;  %v1602_v53 = vld [vmem:[%s2407_s3 + $0x8] sm:$0xff] }
 0x867   :  { %v576_v52 = vsel %vm114_vm6, %v574_v39, 0.0 }
 0x868   :  { %577 = vadd.xlane.f32.xlu1 %v576_v52 }
 0x86a   :  { %v571_v40 = vpop.f32.mrf.mxu0 }
 0x86b   :  { %v572_v41 = vadd.f32 %v571_v40, %v550_v37  ;;  %v1604_v37 = vld [vmem:[%s2407_s3 + $0x18] sm:$0xff]  ;;  %v634_v40 = vperm.slane %v1918_v49, 4 }
 0x86c   :  { %704 = vmatpush.bf16.msrb.mxu1 %v1604_v37 }
 0x86d   :  { %v575_v43 = vadd.f32 %v572_v41, %v1910_v47 }
 0x86f   :  { %v579_v44 = vsel %vm114_vm6, %v575_v43, 0.0 }
 0x870   :  { %580 = vadd.xlane.f32.xlu2 %v579_v44  ;;  %705 = vmatpush.bf16.msrb.mxu1 %v1603_v38 }
 0x874   :  { %706 = vmatpush.bf16.msrb.mxu1 %v1602_v53 }
 0x8db   :  { %v578_v46 = vpop.xlane.xlu1 %577 }
 0x8dc   :  { %v589_v60 = vmul.f32 %v2029_v59, %v578_v46 }
 0x8de   :  { %v591_v61 = vsub.f32 %v574_v39, %v589_v60  ;;  %v1601_v39 = vld [vmem:[%s2407_s3] sm:$0xff] }
 0x8df   :  { %707 = vmatpush.bf16.msrb.mxu1 %v1601_v39 }
 0x8e0   :  { %v593_v62 = vmul.f32 %v591_v61, %v591_v61 }
 0x8e2   :  { %v595_v47 = vsel %vm114_vm6, %v593_v62, 0.0 }
 0x8e3   :  { %v581_v63 = vpop.xlane.xlu2 %580  ;;  %596 = vadd.xlane.f32.xlu0 %v595_v47 }
 0x8e4   :  { %v590_v0 = vmul.f32 %v2029_v59, %v581_v63 }
 0x8e6   :  { %v592_v1 = vsub.f32 %v575_v43, %v590_v0 }
 0x8e8   :  { %v594_v2 = vmul.f32 %v592_v1, %v592_v1 }
 0x8ea   :  { %v598_v3 = vsel %vm114_vm6, %v594_v2, 0.0 }
 0x8eb   :  { %599 = vadd.xlane.f32.xlu1 %v598_v3 }
 0x956   :  { %v597_v7 = vpop.xlane.xlu0 %596 }
 0x957   :  { %v601_v57 = vmul.f32 %v597_v7, %v2029_v59 }
 0x959   :  { %v603_v10 = vadd.f32 1e-05, %v601_v57 }
 0x95b   :  { %1700 = vrsqrt.f32 %v603_v10  ;;  %vm611_vm11 = vweird.f32 %v603_v10 }
 0x95e   :  { %v600_v12 = vpop.xlane.xlu1 %599 }
 0x95f   :  { %v602_v14 = vmul.f32 %v600_v12, %v2029_v59 }
 0x961   :  { %v1701_v15 = vpop.eup %1700  ;;  %v604_v16 = vadd.f32 1e-05, %v602_v14 }
 0x962   :  { %v606_v18 = vmul.f32 %v1701_v15, %v603_v10  ;;  %vm612_vm10 = vweird.f32 %v1701_v15  ;;  %v1608_v10 = vld [vmem:[%s2406_s2 + $0x34] sm:$0xf0] }
 0x963   :  { %1702 = vrsqrt.f32 %v604_v16  ;;  %vm613_vm12 = vmor %vm611_vm11, %vm612_vm10  ;;  %vm621_vm14 = vweird.f32 %v604_v16  ;;  %v2079_v11 = vor.u32 %v1608_v10, %v1542_v9 }
 0x964   :  { %v607_v19 = vmul.f32 %v1701_v15, %v606_v18 }
 0x965   :  { %795 = vmatpush.bf16.msrb.mxu2 %v2079_v11 }
 0x966   :  { %v608_v13 = vmul.f32 0.5, %v607_v19 }
 0x968   :  { %v609_v17 = vsub.f32 1.5, %v608_v13 }
 0x969   :  { %v1703_v20 = vpop.eup %1702 }
 0x96a   :  { %v610_v45 = vmul.f32 %v1701_v15, %v609_v17  ;;  %v616_v21 = vmul.f32 %v1703_v20, %v604_v16  ;;  %vm622_vm13 = vweird.f32 %v1703_v20  ;;  %v1606_v16 = vld [vmem:[%s2406_s2 + $0x24] sm:$0xf0] }
 0x96b   :  { %vm623_vm15 = vmor %vm621_vm14, %vm622_vm13 }
 0x96c   :  { %v617_v42 = vmul.f32 %v1703_v20, %v616_v21  ;;  %v614_v22 = vsel %vm613_vm12, %v1701_v15, %v610_v45  ;;  %v1538_v15 = vld [vmem:[%s2406_s2 + $0x20] sm:$0xf] }
 0x96d   :  { %v625_v25 = vmul.f32 %v614_v22, %v591_v61  ;;  %v2089_v19 = vor.u32 %v1606_v16, %v1538_v15 }
 0x96e   :  { %v618_v23 = vmul.f32 0.5, %v617_v42 }
 0x96f   :  { %v628_v31 = vmul.f32 %v627_v24, %v625_v25  ;;  %796 = vmatpush.bf16.msrb.mxu2 %v2089_v19 }
 0x970   :  { %v619_v58 = vsub.f32 1.5, %v618_v23 }
 0x971   :  { %v631_v34 = vadd.f32 %v630_v30, %v628_v31 }
 0x972   :  { %v620_v28 = vmul.f32 %v1703_v20, %v619_v58 }
 0x974   :  { %v624_v29 = vsel %vm623_vm15, %v1703_v20, %v620_v28 }
 0x975   :  { %v626_v32 = vmul.f32 %v624_v29, %v592_v1 }
 0x977   :  { %v629_v33 = vmul.f32 %v627_v24, %v626_v32  ;;  %v760_v32 = vperm.slane %v1918_v49, 6 }
 0x979   :  { %v632_v35 = vadd.f32 %v630_v30, %v629_v33 }
 0x97b   :  { %v633_v36 = vpack.c.bf16 %v632_v35, %v631_v34 }
 0x97d   :  { %1514 = vmatmul.msk.bf16.vlgmr.msrb.gmra.mxu3 %vm114_vm6, %v633_v36  ;;  %v763_v36 = vperm.slane %v1918_v49, 7 }
 0xa00   :  { %v655_v52 = vpop.f32.mrf.mxu3 }
 0xa01   :  { %v656_v41 = vadd.f32 %v655_v52, %v634_v40 }
 0xa03   :  { %v660_v48 = vmax.f32 %v656_v41, 0.0  ;;  %v2105_v41 = vld [vmem:[%s2409_s5 + $0x8] sm:$0xff] }
 0xa04   :  { %v773_v49 = vperm.slane %v2105_v41, 0 }
 0xa08   :  { %v657_v43 = vpop.f32.mrf.mxu3 }
 0xa09   :  { %v658_v44 = vadd.f32 %v657_v43, %v634_v40 }
 0xa0b   :  { %v661_v50 = vmax.f32 %v658_v44, 0.0 }
 0xa0d   :  { %v670_v51 = vpack.c.bf16 %v661_v50, %v660_v48 }
 0xa0f   :  { %1531 = vmatmul.msk.bf16.vlgmr.msrb.gmra.mxu1 %vm696_vm2, %v670_v51 }
 0xa8c   :  { %v709_v55 = vpop.f32.mrf.mxu1 }
 0xa8d   :  { %v710_v56 = vadd.f32 %v709_v55, %v671_v54 }
 0xa8f   :  { %v714_v46 = vadd.f32 %v710_v56, %v631_v34 }
 0xa91   :  { %v716_v60 = vsel %vm114_vm6, %v714_v46, 0.0 }
 0xa92   :  { %717 = vadd.xlane.f32.xlu2 %v716_v60 }
 0xa94   :  { %v711_v61 = vpop.f32.mrf.mxu1 }
 0xa95   :  { %v712_v62 = vadd.f32 %v711_v61, %v671_v54 }
 0xa97   :  { %v715_v47 = vadd.f32 %v712_v62, %v632_v35 }
 0xa99   :  { %v719_v63 = vsel %vm114_vm6, %v715_v47, 0.0 }
 0xa9a   :  { %720 = vadd.xlane.f32.xlu0 %v719_v63 }
 0xb05   :  { %v718_v0 = vpop.xlane.xlu2 %717 }
 0xb06   :  { %v722_v1 = vmul.f32 %v718_v0, %v2029_v59 }
 0xb08   :  { %v724_v2 = vsub.f32 %v714_v46, %v722_v1 }
 0xb0a   :  { %v726_v3 = vmul.f32 %v724_v2, %v724_v2 }
 0xb0c   :  { %v728_v5 = vsel %vm114_vm6, %v726_v3, 0.0 }
 0xb0d   :  { %v721_v4 = vpop.xlane.xlu0 %720  ;;  %729 = vadd.xlane.f32.xlu1 %v728_v5 }
 0xb0e   :  { %v723_v6 = vmul.f32 %v721_v4, %v2029_v59 }
 0xb10   :  { %v725_v7 = vsub.f32 %v715_v47, %v723_v6 }
 0xb12   :  { %v727_v57 = vmul.f32 %v725_v7, %v725_v7 }
 0xb14   :  { %v731_v8 = vsel %vm114_vm6, %v727_v57, 0.0 }
 0xb15   :  { %732 = vadd.xlane.f32.xlu2 %v731_v8 }
 0xb80   :  { %v730_v12 = vpop.xlane.xlu1 %729 }
 0xb81   :  { %v734_v14 = vmul.f32 %v730_v12, %v2029_v59 }
 0xb83   :  { %v736_v18 = vadd.f32 1e-05, %v734_v14 }
 0xb85   :  { %1704 = vrsqrt.f32 %v736_v18  ;;  %vm744_vm4 = vweird.f32 %v736_v18 }
 0xb88   :  { %v733_v13 = vpop.xlane.xlu2 %732 }
 0xb89   :  { %v735_v17 = vmul.f32 %v733_v13, %v2029_v59 }
 0xb8b   :  { %v1705_v20 = vpop.eup %1704  ;;  %v737_v45 = vadd.f32 1e-05, %v735_v17 }
 0xb8c   :  { %v739_v21 = vmul.f32 %v1705_v20, %v736_v18  ;;  %vm745_vm3 = vweird.f32 %v1705_v20 }
 0xb8d   :  { %1706 = vrsqrt.f32 %v737_v45  ;;  %vm746_vm9 = vmor %vm744_vm4, %vm745_vm3  ;;  %vm754_vm11 = vweird.f32 %v737_v45 }
 0xb8e   :  { %v740_v42 = vmul.f32 %v1705_v20, %v739_v21 }
 0xb90   :  { %v741_v22 = vmul.f32 0.5, %v740_v42 }
 0xb92   :  { %v742_v23 = vsub.f32 1.5, %v741_v22 }
 0xb93   :  { %v1707_v58 = vpop.eup %1706 }
 0xb94   :  { %v743_v24 = vmul.f32 %v1705_v20, %v742_v23  ;;  %v749_v25 = vmul.f32 %v1707_v58, %v737_v45  ;;  %vm755_vm10 = vweird.f32 %v1707_v58 }
 0xb95   :  { %vm756_vm12 = vmor %vm754_vm11, %vm755_vm10 }
 0xb96   :  { %v750_v28 = vmul.f32 %v1707_v58, %v749_v25  ;;  %v747_v29 = vsel %vm746_vm9, %v1705_v20, %v743_v24 }
 0xb97   :  { %v758_v33 = vmul.f32 %v747_v29, %v724_v2 }
 0xb98   :  { %v751_v30 = vmul.f32 0.5, %v750_v28 }
 0xb99   :  { %v761_v37 = vmul.f32 %v760_v32, %v758_v33 }
 0xb9a   :  { %v752_v31 = vsub.f32 1.5, %v751_v30 }
 0xb9b   :  { %v2095_v39 = vadd.f32 %v763_v36, %v761_v37 }
 0xb9c   :  { %v753_v34 = vmul.f32 %v1707_v58, %v752_v31 }
 0xb9e   :  { %v757_v35 = vsel %vm756_vm12, %v1707_v58, %v753_v34 }
 0xb9f   :  { %v759_v38 = vmul.f32 %v757_v35, %v725_v7 }
 0xba1   :  { %v762_v53 = vmul.f32 %v760_v32, %v759_v38 }
 0xba3   :  { %v2097_v52 = vadd.f32 %v763_v36, %v762_v53 }
 0xba5   :  { %v772_v40 = vpack.c.bf16 %v2097_v52, %v2095_v39 }
 0xba7   :  { %1544 = vmatmul.msk.bf16.vlgmr.msrb.gmra.mxu2 %vm114_vm6, %v772_v40 }
 0xc2a   :  { %v798_v43 = vpop.f32.mrf.mxu2 }
 0xc2b   :  { %v799_v44 = vadd.f32 %v798_v43, %v773_v49 }
 0xc2d   :  { %v803_v51 = vmul.f32 0.35355338, %v799_v44 }
 0xc32   :  { %v800_v48 = vpop.f32.mrf.mxu2 }
 0xc33   :  { %v801_v50 = vadd.f32 %v800_v48, %v773_v49 }
 0xc35   :  { %v804_v54 = vmul.f32 0.35355338, %v801_v50  ;;  %v2108_v55 = vpack.c.bf16 %v801_v50, %v799_v44 }
 0xc37   :  { %v805_v56 = vpack.c.bf16 %v804_v54, %v803_v51  ;;  %904 = vrot.lane.b32.xlu1 %v2108_v55, %s1779_s19  ;;  %808 = vrot.lane.b32.xlu0 %v2108_v55, %s1776_s17 }
 0xc39   :  { %902 = vrot.lane.b32.xlu2 %v805_v56, %s1781_s21 }
 0xc3f   :  { %1094 = vrot.lane.b32.xlu1 %v2108_v55, %s1780_s20  ;;  %999 = vrot.lane.b32.xlu0 %v2108_v55, %s1782_s22 }
 0xc41   :  { %1092 = vrot.lane.b32.xlu2 %v805_v56, %s1783_s23 }
 0xc47   :  { %997 = vrot.lane.b32.xlu0 %v805_v56, %s1784_s24 }
 0xc93   :  { %v903_v47 = vpop.permute.xlu2 %902 }
 0xc9b   :  { %v1093_v3 = vpop.permute.xlu2 %1092 }
 0xca9   :  { %v905_v46 = vpop.permute.xlu1 %904  ;;  %v809_v60 = vpop.permute.xlu0 %808 }
 0xcaa   :  { %v910_v61 = vsel %vm139_vm7, %v905_v46, 0  ;;  %v814_v62 = vsel %vm139_vm7, %v809_v60, 0 }
 0xcab   :  { %823 = vmatpush.bf16.xpose.msra.mxu0 %v814_v62  ;;  %919 = vmatpush.bf16.xpose.msra.mxu1 %v910_v61 }
 0xcb1   :  { %v1095_v63 = vpop.permute.xlu1 %1094  ;;  %v1000_v0 = vpop.permute.xlu0 %999 }
 0xcb2   :  { %v1100_v1 = vsel %vm139_vm7, %v1095_v63, 0  ;;  %v1005_v2 = vsel %vm139_vm7, %v1000_v0, 0  ;;  %1545 = vmatmul.msk.bf16.vlgmr.msra.gmra.mxu0 %vm139_vm7, %v805_v56  ;;  %1547 = vmatmul.msk.bf16.vlgmr.msra.gmra.mxu1 %vm139_vm7, %v903_v47 }
 0xcb3   :  { %1014 = vmatpush.bf16.xpose.msrb.mxu0 %v1005_v2  ;;  %1109 = vmatpush.bf16.xpose.msrb.mxu1 %v1100_v1 }
 0xcb9   :  { %v998_v5 = vpop.permute.xlu0 %997 }
 0xcc2   :  { %1549 = vmatmul.msk.bf16.vlgmr.msrb.gmra.mxu0 %vm139_vm7, %v998_v5  ;;  %1551 = vmatmul.msk.bf16.vlgmr.msrb.gmra.mxu1 %vm139_vm7, %v1093_v3 }
 0xd2f   :  { %v825_v4 = vpop.f32.mrf.mxu0  ;;  %v921_v6 = vpop.f32.mrf.mxu1 }
 0xd30   :  { %v830_v7 = vsel %vm1882_vm0, %v825_v4, -1e+30  ;;  %v926_v57 = vsel %vm1882_vm0, %v921_v6, -1e+30 }
 0xd31   :  { %v928_v8 = vsel %vm162_vm8, %v926_v57, -inf  ;;  %v832_v9 = vsel %vm162_vm8, %v830_v7, -inf }
 0xd32   :  { %929 = vmax.xlane.f32.xlu2 %v928_v8  ;;  %833 = vmax.xlane.f32.xlu1 %v832_v9 }
 0xd37   :  { %v827_v10 = vpop.f32.mrf.mxu0  ;;  %v923_v12 = vpop.f32.mrf.mxu1 }
 0xd38   :  { %v831_v14 = vsel %vm1886_vm1, %v827_v10, -1e+30  ;;  %v927_v15 = vsel %vm1886_vm1, %v923_v12, -1e+30 }
 0xd39   :  { %v931_v16 = vsel %vm162_vm8, %v927_v15, -inf  ;;  %v835_v18 = vsel %vm162_vm8, %v831_v14, -inf }
 0xd3a   :  { %932 = vmax.xlane.f32.xlu1 %v931_v16  ;;  %836 = vmax.xlane.f32.xlu0 %v835_v18 }
 0xd3f   :  { %v1016_v13 = vpop.f32.mrf.mxu0  ;;  %v1111_v17 = vpop.f32.mrf.mxu1 }
 0xd40   :  { %v1021_v20 = vsel %vm1882_vm0, %v1016_v13, -1e+30  ;;  %v1116_v45 = vsel %vm1882_vm0, %v1111_v17, -1e+30 }
 0xd41   :  { %v1118_v21 = vsel %vm162_vm8, %v1116_v45, -inf  ;;  %v1023_v42 = vsel %vm162_vm8, %v1021_v20, -inf }
 0xd42   :  { %1119 = vmax.xlane.f32.xlu1 %v1118_v21  ;;  %1024 = vmax.xlane.f32.xlu2 %v1023_v42 }
 0xd47   :  { %v1018_v22 = vpop.f32.mrf.mxu0  ;;  %v1113_v23 = vpop.f32.mrf.mxu1 }
 0xd48   :  { %v1022_v58 = vsel %vm1886_vm1, %v1018_v22, -1e+30  ;;  %v1117_v24 = vsel %vm1886_vm1, %v1113_v23, -1e+30 }
 0xd49   :  { %v1121_v25 = vsel %vm162_vm8, %v1117_v24, -inf  ;;  %v1026_v28 = vsel %vm162_vm8, %v1022_v58, -inf }
 0xd4a   :  { %1122 = vmax.xlane.f32.xlu2 %v1121_v25  ;;  %1027 = vmax.xlane.f32.xlu0 %v1026_v28 }
 0xda5   :  { %v930_v26 = vpop.xlane.xlu2 %929  ;;  %v834_v29 = vpop.xlane.xlu1 %833 }
 0xda6   :  { %v934_v30 = vsub.f32 %v926_v57, %v930_v26  ;;  %v838_v31 = vsub.f32 %v830_v7, %v834_v29 }
 0xda8   :  { %v936_v32 = vmul.f32 1.442695, %v934_v30  ;;  %v840_v33 = vmul.f32 1.442695, %v838_v31 }
 0xdaa   :  { %1708 = vpow2.f32 %v936_v32 }
 0xdab   :  { %1710 = vpow2.f32 %v840_v33 }
 0xdad   :  { %v933_v34 = vpop.xlane.xlu1 %932  ;;  %v837_v35 = vpop.xlane.xlu0 %836 }
 0xdae   :  { %v935_v36 = vsub.f32 %v927_v15, %v933_v34  ;;  %v839_v37 = vsub.f32 %v831_v14, %v837_v35 }
 0xdb0   :  { %v2153_v27 = vpop.eup %1708  ;;  %v938_v38 = vmul.f32 1.442695, %v935_v36  ;;  %v842_v53 = vmul.f32 1.442695, %v839_v37 }
 0xdb1   :  { %v2155_v40 = vpop.eup %1710  ;;  %v940_v43 = vsel %vm162_vm8, %v2153_v27, 0.0 }
 0xdb2   :  { %1712 = vpow2.f32 %v938_v38  ;;  %941 = vadd.xlane.f32.xlu2 %v940_v43  ;;  %v844_v49 = vsel %vm162_vm8, %v2155_v40, 0.0 }
 0xdb3   :  { %1714 = vpow2.f32 %v842_v53  ;;  %845 = vadd.xlane.f32.xlu0 %v844_v49 }
 0xdb5   :  { %v1120_v44 = vpop.xlane.xlu1 %1119  ;;  %v1025_v48 = vpop.xlane.xlu2 %1024 }
 0xdb6   :  { %v1124_v50 = vsub.f32 %v1116_v45, %v1120_v44  ;;  %v1029_v51 = vsub.f32 %v1021_v20, %v1025_v48 }
 0xdb8   :  { %v2161_v54 = vpop.eup %1712  ;;  %v1126_v56 = vmul.f32 1.442695, %v1124_v50  ;;  %v1031_v46 = vmul.f32 1.442695, %v1029_v51 }
 0xdb9   :  { %v2163_v60 = vpop.eup %1714  ;;  %v943_v61 = vsel %vm162_vm8, %v2161_v54, 0.0 }
 0xdba   :  { %1716 = vpow2.f32 %v1126_v56  ;;  %v847_v62 = vsel %vm162_vm8, %v2163_v60, 0.0 }
 0xdbb   :  { %1718 = vpow2.f32 %v1031_v46  ;;  %944 = vadd.xlane.f32.xlu0 %v943_v61  ;;  %848 = vadd.xlane.f32.xlu1 %v847_v62 }
 0xdbd   :  { %v1123_v47 = vpop.xlane.xlu2 %1122  ;;  %v1028_v63 = vpop.xlane.xlu0 %1027 }
 0xdbe   :  { %v1125_v0 = vsub.f32 %v1117_v24, %v1123_v47  ;;  %v1030_v1 = vsub.f32 %v1022_v58, %v1028_v63 }
 0xdc0   :  { %v2169_v2 = vpop.eup %1716  ;;  %v1128_v3 = vmul.f32 1.442695, %v1125_v0  ;;  %v1033_v5 = vmul.f32 1.442695, %v1030_v1 }
 0xdc1   :  { %v2171_v4 = vpop.eup %1718  ;;  %v1130_v6 = vsel %vm162_vm8, %v2169_v2, 0.0 }
 0xdc2   :  { %1720 = vpow2.f32 %v1128_v3  ;;  %v1035_v7 = vsel %vm162_vm8, %v2171_v4, 0.0 }
 0xdc3   :  { %1722 = vpow2.f32 %v1033_v5  ;;  %1131 = vadd.xlane.f32.xlu0 %v1130_v6  ;;  %1036 = vadd.xlane.f32.xlu1 %v1035_v7 }
 0xdc8   :  { %v2177_v57 = vpop.eup %1720 }
 0xdc9   :  { %v2179_v8 = vpop.eup %1722  ;;  %v1133_v9 = vsel %vm162_vm8, %v2177_v57, 0.0 }
 0xdca   :  { %v1038_v10 = vsel %vm162_vm8, %v2179_v8, 0.0 }
 0xdcb   :  { %1134 = vadd.xlane.f32.xlu1 %v1133_v9  ;;  %1039 = vadd.xlane.f32.xlu2 %v1038_v10 }
 0xdd7   :  { %977 = vrot.lane.b32.xlu0 %v2108_v55, %s1778_s0 }
 0xddf   :  { %1167 = vrot.lane.b32.xlu0 %v2108_v55, %s1785_s25 }
 0xde3   :  { %881 = vrot.lane.b32.xlu2 %v2108_v55, %s1777_s18 }
 0xde4   :  { %1072 = vrot.lane.b32.xlu1 %v2108_v55, %s1786_s26 }
 0xdeb   :  { %1221 = vrot.lane.b32.xlu2 %v2079_v11, %s1788_s28 }
 0xe25   :  { %v2197_v14 = vpop.xlane.xlu2 %941 }
 0xe26   :  { %v2195_v12 = vpop.xlane.xlu0 %845  ;;  %vm951_vm0 = vweird.f32 %v2197_v14  ;;  %v955_v26 = vand.u32 2147483647, %v2197_v14  ;;  %v957_v47 = vand.u32 2147483648, %v2197_v14 }
 0xe27   :  { %1724 = vrcp.f32 %v2195_v12  ;;  %vm855_vm15 = vweird.f32 %v2195_v12  ;;  %v861_v36 = vand.u32 2147483648, %v2195_v12  ;;  %v859_v43 = vand.u32 2147483647, %v2195_v12 }
 0xe28   :  { %1726 = vrcp.f32 %v2197_v14 }
 0xe29   :  { %v862_v3 = vor.u32 1.1754944e-38, %v861_v36 }
 0xe2d   :  { %v2201_v15 = vpop.eup %1724 }
 0xe2e   :  { %v849_v16 = vpop.xlane.xlu1 %848  ;;  %v2203_v18 = vpop.xlane.xlu0 %944  ;;  %v851_v55 = vmul.f32 %v2201_v15, %v2195_v12  ;;  %vm856_vm13 = vweird.f32 %v2201_v15 }
 0xe2f   :  { %1728 = vrcp.f32 %v849_v16  ;;  %v2205_v13 = vpop.eup %1726  ;;  %v876_v31 = vand.u32 2147483648, %v849_v16  ;;  %vm870_vm14 = vweird.f32 %v849_v16  ;;  %v874_v35 = vand.u32 2147483647, %v849_v16  ;;  %vm2245_vm10 = vmor %vm855_vm15, %vm856_vm13 }
 0xe30   :  { %1730 = vrcp.f32 %v2203_v18  ;;  %v947_v11 = vmul.f32 %v2205_v13, %v2197_v14  ;;  %v852_v17 = vsub.f32 1.0, %v851_v55  ;;  %vm952_vm9 = vweird.f32 %v2205_v13 }
 0xe31   :  { %v972_v44 = vand.u32 2147483648, %v2203_v18  ;;  %v877_v46 = vor.u32 1.1754944e-38, %v876_v31  ;;  %vm966_vm11 = vweird.f32 %v2203_v18  ;;  %v970_v61 = vand.u32 2147483647, %v2203_v18  ;;  %vm953_vm13 = vmor %vm951_vm0, %vm952_vm9 }
 0xe32   :  { %v948_v22 = vsub.f32 1.0, %v947_v11  ;;  %v853_v24 = vmul.f32 %v2201_v15, %v852_v17  ;;  %vm875_vm12 = vcmp.eq.f32.partialorder %v874_v35, 8.507059e+37 }
 0xe33   :  { %v973_v7 = vor.u32 1.1754944e-38, %v972_v44  ;;  %vm971_vm15 = vcmp.eq.f32.partialorder %v970_v61, 8.507059e+37 }
 0xe34   :  { %v949_v30 = vmul.f32 %v2205_v13, %v948_v22  ;;  %v854_v33 = vadd.f32 %v2201_v15, %v853_v24 }
 0xe35   :  { %v1729_v20 = vpop.eup %1728 }
 0xe36   :  { %v1731_v45 = vpop.eup %1730  ;;  %v866_v21 = vmul.f32 %v1729_v20, %v849_v16  ;;  %v2212_v42 = vpop.xlane.xlu1 %1036  ;;  %vm871_vm1 = vweird.f32 %v1729_v20  ;;  %v950_v51 = vadd.f32 %v2205_v13, %v949_v30  ;;  %v858_v63 = vsel %vm2245_vm10, %v2201_v15, %v854_v33 }
 0xe37   :  { %v962_v23 = vmul.f32 %v1731_v45, %v2203_v18  ;;  %v2215_v58 = vpop.xlane.xlu0 %1131  ;;  %1732 = vrcp.f32 %v2212_v42  ;;  %vm2227_vm3 = vmor %vm870_vm14, %vm871_vm1  ;;  %vm967_vm4 = vweird.f32 %v1731_v45  ;;  %vm860_vm14 = vcmp.eq.f32.partialorder %v859_v43, 8.507059e+37 }
 0xe38   :  { %v867_v25 = vsub.f32 1.0, %v866_v21  ;;  %1734 = vrcp.f32 %v2215_v58  ;;  %vm2258_vm1 = vmor %vm966_vm11, %vm967_vm4  ;;  %v954_v9 = vsel %vm953_vm13, %v2205_v13, %v950_v51  ;;  %v863_v10 = vsel %vm860_vm14, %v862_v3, %v858_v63 }
 0xe39   :  { %v963_v28 = vsub.f32 1.0, %v962_v23  ;;  %v958_v15 = vor.u32 1.1754944e-38, %v957_v47  ;;  %v864_v14 = vmul.f32 %v2155_v40, %v863_v10  ;;  %vm1046_vm0 = vweird.f32 %v2212_v42 }
 0xe3a   :  { %v868_v29 = vmul.f32 %v1729_v20, %v867_v25  ;;  %v1050_v40 = vand.u32 2147483647, %v2212_v42  ;;  %vm1141_vm10 = vweird.f32 %v2215_v58  ;;  %v1145_v56 = vand.u32 2147483647, %v2215_v58 }
 0xe3b   :  { %v964_v32 = vmul.f32 %v1731_v45, %v963_v28 }
 0xe3c   :  { %v869_v34 = vadd.f32 %v1729_v20, %v868_v29 }
 0xe3d   :  { %v965_v38 = vadd.f32 %v1731_v45, %v964_v32  ;;  %v2231_v53 = vpop.eup %1732 }
 0xe3e   :  { %v873_v49 = vsel %vm2227_vm3, %v1729_v20, %v869_v34  ;;  %v2238_v48 = vpop.xlane.xlu1 %1134  ;;  %v2240_v50 = vpop.xlane.xlu2 %1039  ;;  %v1042_v1 = vmul.f32 %v2231_v53, %v2212_v42  ;;  %vm956_vm3 = vcmp.eq.f32.partialorder %v955_v26, 8.507059e+37  ;;  %v1052_v26 = vand.u32 2147483648, %v2212_v42 }
 0xe3f   :  { %v2251_v62 = vpop.eup %1734  ;;  %v878_v5 = vsel %vm875_vm12, %v877_v46, %v873_v49  ;;  %v969_v6 = vsel %vm2258_vm1, %v1731_v45, %v965_v38  ;;  %1736 = vrcp.f32 %v2238_v48  ;;  %v959_v11 = vsel %vm956_vm3, %v958_v15, %v954_v9 }
 0xe40   :  { %1738 = vrcp.f32 %v2240_v50  ;;  %v1137_v12 = vmul.f32 %v2251_v62, %v2215_v58  ;;  %v879_v16 = vmul.f32 %v2163_v60, %v878_v5  ;;  %v974_v18 = vsel %vm971_vm15, %v973_v7, %v969_v6 }
 0xe41   :  { %v1043_v55 = vsub.f32 1.0, %v1042_v1  ;;  %v975_v45 = vmul.f32 %v2161_v54, %v974_v18  ;;  %v960_v60 = vmul.f32 %v2153_v27, %v959_v11  ;;  %vm1047_vm4 = vweird.f32 %v2231_v53 }
 0xe42   :  { %v1138_v21 = vsub.f32 1.0, %v1137_v12  ;;  %v880_v24 = vpack.c.bf16 %v879_v16, %v864_v14  ;;  %v1067_v33 = vand.u32 2147483648, %v2240_v50  ;;  %v1065_v35 = vand.u32 2147483647, %v2240_v50  ;;  %vm2295_vm12 = vmor %vm1046_vm0, %vm1047_vm4 }
 0xe43   :  { %v1044_v22 = vmul.f32 %v2231_v53, %v1043_v55  ;;  %v976_v31 = vpack.c.bf16 %v975_v45, %v960_v60  ;;  %vm1142_vm1 = vweird.f32 %v2251_v62  ;;  %vm1156_vm13 = vweird.f32 %v2238_v48 }
 0xe44   :  { %v1139_v29 = vmul.f32 %v2251_v62, %v1138_v21  ;;  %v1162_v38 = vand.u32 2147483648, %v2238_v48  ;;  %v1160_v44 = vand.u32 2147483647, %v2238_v48  ;;  %vm1061_vm15 = vweird.f32 %v2240_v50 }
 0xe45   :  { %v1737_v20 = vpop.eup %1736  ;;  %v1045_v27 = vadd.f32 %v2231_v53, %v1044_v22  ;;  %v1147_v46 = vand.u32 2147483648, %v2215_v58  ;;  %v1068_v61 = vor.u32 1.1754944e-38, %v1067_v33  ;;  %v1053_v47 = vor.u32 1.1754944e-38, %v1052_v26 }
 0xe46   :  { %v882_v17 = vpop.permute.xlu2 %881  ;;  %v1739_v13 = vpop.eup %1738  ;;  %v1152_v23 = vmul.f32 %v1737_v20, %v2238_v48  ;;  %vm1157_vm9 = vweird.f32 %v1737_v20  ;;  %v1140_v43 = vadd.f32 %v2251_v62, %v1139_v29  ;;  %vm1066_vm0 = vcmp.eq.f32.partialorder %v1065_v35, 8.507059e+37 }
 0xe47   :  { %894 = vmatpush.bf16.msra.mxu3 %v882_v17  ;;  %v1057_v25 = vmul.f32 %v1739_v13, %v2240_v50  ;;  %vm1062_vm11 = vweird.f32 %v1739_v13  ;;  %vm2303_vm14 = vmor %vm1156_vm13, %vm1157_vm9  ;;  %v1049_v51 = vsel %vm2295_vm12, %v2231_v53, %v1045_v27  ;;  %vm1051_vm4 = vcmp.eq.f32.partialorder %v1050_v40, 8.507059e+37 }
 0xe48   :  { %v1153_v54 = vsub.f32 1.0, %v1152_v23  ;;  %vm1063_vm3 = vmor %vm1061_vm15, %vm1062_vm11  ;;  %v1163_v53 = vor.u32 1.1754944e-38, %v1162_v38  ;;  %v1054_v1 = vsel %vm1051_vm4, %v1053_v47, %v1049_v51  ;;  %vm1161_vm11 = vcmp.eq.f32.partialorder %v1160_v44, 8.507059e+37 }
 0xe49   :  { %v978_v28 = vpop.permute.xlu0 %977  ;;  %v1058_v30 = vsub.f32 1.0, %v1057_v25  ;;  %vm1143_vm9 = vmor %vm1141_vm10, %vm1142_vm1  ;;  %v1148_v5 = vor.u32 1.1754944e-38, %v1147_v46  ;;  %vm1146_vm12 = vcmp.eq.f32.partialorder %v1145_v56, 8.507059e+37  ;;  %v1055_v9 = vmul.f32 %v2171_v4, %v1054_v1  ;;  %v1607_v1 = vld [vmem:[%s2406_s2 + $0x34] sm:$0xf] }
 0xe4a   :  { %1546 = vmatmul.msk.bf16.vlgmr.msra.gmra.mxu3 %vm162_vm8, %v880_v24  ;;  %990 = vmatpush.bf16.msra.mxu2 %v978_v28  ;;  %v1154_v32 = vmul.f32 %v1737_v20, %v1153_v54  ;;  %v1144_v3 = vsel %vm1143_vm9, %v2251_v62, %v1140_v43  ;;  %vm1433_vm9 = vcmask 1040384  }
 0xe4b   :  { %v1059_v34 = vmul.f32 %v1739_v13, %v1058_v30  ;;  %v1149_v10 = vsel %vm1146_vm12, %v1148_v5, %v1144_v3  ;;  %v1558_v3 = vld [vmem:[%s2406_s2 + $0x38] sm:$0xf0] }
 0xe4c   :  { %v1155_v37 = vadd.f32 %v1737_v20, %v1154_v32  ;;  %v1150_v16 = vmul.f32 %v2169_v2, %v1149_v10  ;;  %v1561_v5 = vor.u32 %v1607_v1, %v1558_v3 }
 0xe4d   :  { %1548 = vmatmul.msk.bf16.vlgmr.msra.gmra.mxu2 %vm162_vm8, %v976_v31  ;;  %v1060_v42 = vadd.f32 %v1739_v13, %v1059_v34  ;;  %v1218_v34 = vperm.slane %v2105_v41, 1 }
 0xe4e   :  { %v1159_v63 = vsel %vm2303_vm14, %v1737_v20, %v1155_v37  ;;  %v1222_v62 = vpop.permute.xlu2 %1221 }
 0xe4f   :  { %v1064_v0 = vsel %vm1063_vm3, %v1739_v13, %v1060_v42  ;;  %v1164_v6 = vsel %vm1161_vm11, %v1163_v53, %v1159_v63  ;;  %1234 = vmatpush.bf16.msra.mxu0 %v1222_v62 }
 0xe50   :  { %v1069_v50 = vsel %vm1066_vm0, %v1068_v61, %v1064_v0  ;;  %v1165_v15 = vmul.f32 %v2177_v57, %v1164_v6 }
 0xe51   :  { %v1168_v48 = vpop.permute.xlu0 %1167  ;;  %v1070_v7 = vmul.f32 %v2179_v8, %v1069_v50 }
 0xe52   :  { %1180 = vmatpush.bf16.msrb.mxu2 %v1168_v48  ;;  %v1166_v18 = vpack.c.bf16 %v1165_v15, %v1150_v16 }
 0xe53   :  { %v1071_v58 = vpack.c.bf16 %v1070_v7, %v1055_v9  ;;  %v1605_v7 = vld [vmem:[%s2406_s2 + $0x24] sm:$0xf]  ;;  %v1554_v9 = vld [vmem:[%s2406_s2 + $0x28] sm:$0xf0] }
 0xe54   :  { %v1557_v10 = vor.u32 %v1605_v7, %v1554_v9  ;;  %v1614_v9 = vld [vmem:[%s2408_s4 + $0x8] sm:$0xff] }
 0xe56   :  { %v1073_v12 = vpop.permute.xlu1 %1072  ;;  %1463 = vmatpush.bf16.msra.mxu2 %v1614_v9 }
 0xe57   :  { %1085 = vmatpush.bf16.msrb.mxu3 %v1073_v12 }
 0xe5a   :  { %1550 = vmatmul.msk.bf16.vlgmr.msrb.gmra.mxu3 %vm162_vm8, %v1071_v58 }
 0xe5b   :  { %1313 = vmatpush.bf16.msra.mxu3 %v1561_v5 }
 0xe5d   :  { %1552 = vmatmul.msk.bf16.vlgmr.msrb.gmra.mxu2 %vm162_vm8, %v1166_v18 }
 0xe5f   :  { %1314 = vmatpush.bf16.msra.mxu3 %v1557_v10  ;;  %v1613_v10 = vld [vmem:[%s2408_s4] sm:$0xff] }
 0xe60   :  { %1464 = vmatpush.bf16.msra.mxu2 %v1613_v10 }
 0xecd   :  { %v896_v55 = vpop.f32.mrf.mxu3 }
 0xed0   :  { %v992_v8 = vpop.f32.mrf.mxu2 }
 0xed5   :  { %v898_v11 = vpop.f32.mrf.mxu3 }
 0xed8   :  { %v994_v14 = vpop.f32.mrf.mxu2 }
 0xed9   :  { %v1650_v4 = vpack.i.bf16 %v994_v14, %v992_v8 }
 0xedb   :  { %1651 = vrot.lane.b32.xlu0 %v1650_v4, %s1787_s27 }
 0xedd   :  { %v1087_v17 = vpop.f32.mrf.mxu3 }
 0xee0   :  { %v1182_v57 = vpop.f32.mrf.mxu2 }
 0xee3   :  { %1219 = vrot.lane.b32.xlu0 %v2089_v19, %s1788_s28 }
 0xee5   :  { %v1089_v2 = vpop.f32.mrf.mxu3 }
 0xee6   :  { %v1655_v20 = vpack.i.bf16 %v1089_v2, %v1087_v17 }
 0xee8   :  { %1656 = vrot.lane.b32.xlu2 %v1655_v20, %s1789_s29  ;;  %v1184_v45 = vpop.f32.mrf.mxu2 }
 0xee9   :  { %v1660_v21 = vpack.i.bf16 %v1184_v45, %v1182_v57  ;;  %v1288_v45 = vperm.slane %v2105_v41, 2 }
 0xeeb   :  { %1661 = vrot.lane.b32.xlu1 %v1660_v21, %s1790_s30 }
 0xf42   :  { %v1657_v60 = vpop.permute.xlu2 %1656 }
 0xf43   :  { %v1659_v40 = vunpack.i.h.bf16 %v1657_v60  ;;  %v1658_v19 = vunpack.i.l.bf16 %v1657_v60 }
 0xf4d   :  { %v1652_v13 = vpop.permute.xlu0 %1651 }
 0xf4e   :  { %v1654_v23 = vunpack.i.h.bf16 %v1652_v13  ;;  %v1653_v24 = vunpack.i.l.bf16 %v1652_v13 }
 0xf50   :  { %v1212_v25 = vsel %vm139_vm7, %v898_v11, %v1654_v23  ;;  %v1211_v28 = vsel %vm139_vm7, %v896_v55, %v1653_v24  ;;  %v1291_v23 = vperm.slane %v2105_v41, 3 }
 0xf51   :  { %v1213_v30 = vsel %vm162_vm8, %v1211_v28, %v1658_v19  ;;  %v1214_v31 = vsel %vm162_vm8, %v1212_v25, %v1659_v40 }
 0xf55   :  { %v1220_v22 = vpop.permute.xlu0 %1219 }
 0xf56   :  { %1235 = vmatpush.bf16.msra.mxu0 %v1220_v22 }
 0xf5d   :  { %v1662_v26 = vpop.permute.xlu1 %1661 }
 0xf5e   :  { %v1664_v54 = vunpack.i.h.bf16 %v1662_v26  ;;  %v1663_v29 = vunpack.i.l.bf16 %v1662_v26  ;;  %v1612_v26 = vld [vmem:[%s2407_s3 + $0x38] sm:$0xff] }
 0xf5f   :  { %1365 = vmatpush.bf16.msra.mxu1 %v1612_v26 }
 0xf60   :  { %v1215_v27 = vsel %vm546_vm5, %v1213_v30, %v1663_v29  ;;  %v1216_v32 = vsel %vm546_vm5, %v1214_v31, %v1664_v54  ;;  %v1611_v54 = vld [vmem:[%s2407_s3 + $0x30] sm:$0xff]  ;;  %v1610_v29 = vld [vmem:[%s2407_s3 + $0x28] sm:$0xff]  ;;  %v1609_v30 = vld [vmem:[%s2407_s3 + $0x20] sm:$0xff] }
 0xf61   :  { %v1217_v33 = vpack.c.bf16 %v1216_v32, %v1215_v27  ;;  %v1295_v27 = vperm.slane %v2105_v41, 4 }
 0xf63   :  { %1553 = vmatmul.msk.bf16.vlgmr.msra.gmra.mxu0 %vm114_vm6, %v1217_v33  ;;  %1366 = vmatpush.bf16.msra.mxu1 %v1611_v54 }
 0xf67   :  { %1367 = vmatpush.bf16.msra.mxu1 %v1610_v29  ;;  %v1665_v29 = vld [vmem:[%s2409_s5 + $0x10] ss:$0 sm:$0xff] }
 0xf6b   :  { %1368 = vmatpush.bf16.msra.mxu1 %v1609_v30 }
 0xfe0   :  { %v1237_v35 = vpop.f32.mrf.mxu0 }
 0xfe1   :  { %v1238_v36 = vadd.f32 %v1237_v35, %v1218_v34 }
 0xfe3   :  { %v1242_v37 = vadd.f32 %v1238_v36, %v2095_v39 }
 0xfe5   :  { %v1244_v38 = vsel %vm114_vm6, %v1242_v37, 0.0 }
 0xfe6   :  { %1245 = vadd.xlane.f32.xlu2 %v1244_v38  ;;  %v1333_v38 = vperm.slane %v2105_v41, 5 }
 0xfe8   :  { %v1239_v43 = vpop.f32.mrf.mxu0 }
 0xfe9   :  { %v1240_v49 = vadd.f32 %v1239_v43, %v1218_v34 }
 0xfeb   :  { %v1243_v44 = vadd.f32 %v1240_v49, %v2097_v52 }
 0xfed   :  { %v1247_v42 = vsel %vm114_vm6, %v1243_v44, 0.0 }
 0xfee   :  { %1248 = vadd.xlane.f32.xlu1 %v1247_v42 }
0x1059   :  { %v1246_v51 = vpop.xlane.xlu2 %1245 }
0x105a   :  { %v1250_v56 = vmul.f32 %v1246_v51, %v2029_v59 }
0x105c   :  { %v1252_v46 = vsub.f32 %v1242_v37, %v1250_v56 }
0x105e   :  { %v1254_v61 = vmul.f32 %v1252_v46, %v1252_v46 }
0x1060   :  { %v1256_v47 = vsel %vm114_vm6, %v1254_v61, 0.0 }
0x1061   :  { %v1249_v63 = vpop.xlane.xlu1 %1248  ;;  %1257 = vadd.xlane.f32.xlu0 %v1256_v47 }
0x1062   :  { %v1251_v39 = vmul.f32 %v1249_v63, %v2029_v59 }
0x1064   :  { %v1253_v0 = vsub.f32 %v1243_v44, %v1251_v39 }
0x1066   :  { %v1255_v48 = vmul.f32 %v1253_v0, %v1253_v0 }
0x1068   :  { %v1259_v53 = vsel %vm114_vm6, %v1255_v48, 0.0 }
0x1069   :  { %1260 = vadd.xlane.f32.xlu2 %v1259_v53 }
0x10d4   :  { %v1258_v52 = vpop.xlane.xlu0 %1257 }
0x10d5   :  { %v1262_v50 = vmul.f32 %v1258_v52, %v2029_v59 }
0x10d7   :  { %v1264_v6 = vadd.f32 1e-05, %v1262_v50 }
0x10d9   :  { %1740 = vrsqrt.f32 %v1264_v6  ;;  %vm1272_vm8 = vweird.f32 %v1264_v6 }
0x10dc   :  { %v1261_v12 = vpop.xlane.xlu2 %1260 }
0x10dd   :  { %v1263_v15 = vmul.f32 %v1261_v12, %v2029_v59 }
0x10df   :  { %v1741_v58 = vpop.eup %1740  ;;  %v1265_v16 = vadd.f32 1e-05, %v1263_v15 }
0x10e0   :  { %v1267_v18 = vmul.f32 %v1741_v58, %v1264_v6  ;;  %vm1273_vm7 = vweird.f32 %v1741_v58 }
0x10e1   :  { %1742 = vrsqrt.f32 %v1265_v16  ;;  %vm1274_vm5 = vmor %vm1272_vm8, %vm1273_vm7  ;;  %vm1282_vm1 = vweird.f32 %v1265_v16 }
0x10e2   :  { %v1268_v62 = vmul.f32 %v1741_v58, %v1267_v18 }
0x10e4   :  { %v1269_v55 = vmul.f32 0.5, %v1268_v62 }
0x10e6   :  { %v1270_v8 = vsub.f32 1.5, %v1269_v55 }
0x10e7   :  { %v1743_v11 = vpop.eup %1742 }
0x10e8   :  { %v1271_v14 = vmul.f32 %v1741_v58, %v1270_v8  ;;  %v1277_v4 = vmul.f32 %v1743_v11, %v1265_v16  ;;  %vm1283_vm10 = vweird.f32 %v1743_v11 }
0x10e9   :  { %vm1284_vm13 = vmor %vm1282_vm1, %vm1283_vm10 }
0x10ea   :  { %v1278_v17 = vmul.f32 %v1743_v11, %v1277_v4  ;;  %v1275_v57 = vsel %vm1274_vm5, %v1741_v58, %v1271_v14 }
0x10eb   :  { %v1286_v21 = vmul.f32 %v1275_v57, %v1252_v46 }
0x10ec   :  { %v1279_v2 = vmul.f32 0.5, %v1278_v17 }
0x10ed   :  { %v1289_v24 = vmul.f32 %v1288_v45, %v1286_v21 }
0x10ee   :  { %v1280_v20 = vsub.f32 1.5, %v1279_v2 }
0x10ef   :  { %v1292_v28 = vadd.f32 %v1291_v23, %v1289_v24 }
0x10f0   :  { %v1281_v13 = vmul.f32 %v1743_v11, %v1280_v20  ;;  %v1421_v20 = vperm.slane %v2105_v41, 6 }
0x10f2   :  { %v1285_v22 = vsel %vm1284_vm13, %v1743_v11, %v1281_v13  ;;  %v1424_v13 = vperm.slane %v2105_v41, 7 }
0x10f3   :  { %v1287_v60 = vmul.f32 %v1285_v22, %v1253_v0 }
0x10f5   :  { %v1290_v25 = vmul.f32 %v1288_v45, %v1287_v60 }
0x10f7   :  { %v1293_v40 = vadd.f32 %v1291_v23, %v1290_v25 }
0x10f9   :  { %v1294_v19 = vpack.c.bf16 %v1293_v40, %v1292_v28 }
0x10fb   :  { %1562 = vmatmul.msk.bf16.vlgmr.msra.gmra.mxu3 %vm114_vm6, %v1294_v19 }
0x117e   :  { %v1316_v31 = vpop.f32.mrf.mxu3 }
0x117f   :  { %v1317_v32 = vadd.f32 %v1316_v31, %v1295_v27 }
0x1181   :  { %v1321_v35 = vmax.f32 %v1317_v32, 0.0 }
0x1186   :  { %v1318_v33 = vpop.f32.mrf.mxu3 }
0x1187   :  { %v1319_v34 = vadd.f32 %v1318_v33, %v1295_v27 }
0x1189   :  { %v1322_v36 = vmax.f32 %v1319_v34, 0.0 }
0x118b   :  { %v1332_v37 = vpack.c.bf16 %v1322_v36, %v1321_v35 }
0x118d   :  { %1587 = vmatmul.msk.bf16.vlgmr.msra.gmra.mxu1 %vm696_vm2, %v1332_v37 }
0x120a   :  { %v1370_v43 = vpop.f32.mrf.mxu1 }
0x120b   :  { %v1371_v49 = vadd.f32 %v1370_v43, %v1333_v38 }
0x120d   :  { %v1375_v44 = vadd.f32 %v1371_v49, %v1292_v28 }
0x120f   :  { %v1377_v42 = vsel %vm114_vm6, %v1375_v44, 0.0 }
0x1210   :  { %1378 = vadd.xlane.f32.xlu1 %v1377_v42 }
0x1212   :  { %v1372_v51 = vpop.f32.mrf.mxu1 }
0x1213   :  { %v1373_v56 = vadd.f32 %v1372_v51, %v1333_v38 }
0x1215   :  { %v1376_v46 = vadd.f32 %v1373_v56, %v1293_v40 }
0x1217   :  { %v1380_v61 = vsel %vm114_vm6, %v1376_v46, 0.0 }
0x1218   :  { %1381 = vadd.xlane.f32.xlu0 %v1380_v61 }
0x1283   :  { %v1379_v47 = vpop.xlane.xlu1 %1378 }
0x1284   :  { %v1383_v63 = vmul.f32 %v1379_v47, %v2029_v59 }
0x1286   :  { %v1385_v39 = vsub.f32 %v1375_v44, %v1383_v63 }
0x1288   :  { %v1387_v0 = vmul.f32 %v1385_v39, %v1385_v39 }
0x128a   :  { %v1389_v48 = vsel %vm114_vm6, %v1387_v0, 0.0 }
0x128b   :  { %v1382_v53 = vpop.xlane.xlu0 %1381  ;;  %1390 = vadd.xlane.f32.xlu2 %v1389_v48 }
0x128c   :  { %v1384_v52 = vmul.f32 %v1382_v53, %v2029_v59 }
0x128e   :  { %v1386_v50 = vsub.f32 %v1376_v46, %v1384_v52 }
0x1290   :  { %v1388_v1 = vmul.f32 %v1386_v50, %v1386_v50 }
0x1292   :  { %v1392_v3 = vsel %vm114_vm6, %v1388_v1, 0.0 }
0x1293   :  { %1393 = vadd.xlane.f32.xlu1 %v1392_v3 }
0x12fe   :  { %v1391_v5 = vpop.xlane.xlu2 %1390 }
0x12ff   :  { %v1395_v6 = vmul.f32 %v1391_v5, %v2029_v59 }
0x1301   :  { %v1397_v7 = vadd.f32 1e-05, %v1395_v6 }
0x1303   :  { %1744 = vrsqrt.f32 %v1397_v7  ;;  %vm1405_vm14 = vweird.f32 %v1397_v7 }
0x1306   :  { %v1394_v12 = vpop.xlane.xlu1 %1393 }
0x1307   :  { %v1396_v15 = vmul.f32 %v1394_v12, %v2029_v59 }
0x1309   :  { %v1745_v58 = vpop.eup %1744  ;;  %v1398_v16 = vadd.f32 1e-05, %v1396_v15 }
0x130a   :  { %v1400_v18 = vmul.f32 %v1745_v58, %v1397_v7  ;;  %vm1406_vm2 = vweird.f32 %v1745_v58 }
0x130b   :  { %1746 = vrsqrt.f32 %v1398_v16  ;;  %vm1407_vm15 = vmor %vm1405_vm14, %vm1406_vm2  ;;  %vm1415_vm0 = vweird.f32 %v1398_v16 }
0x130c   :  { %v1401_v62 = vmul.f32 %v1745_v58, %v1400_v18 }
0x130e   :  { %v1402_v55 = vmul.f32 0.5, %v1401_v62 }
0x1310   :  { %v1403_v8 = vsub.f32 1.5, %v1402_v55 }
0x1311   :  { %v1747_v11 = vpop.eup %1746 }
0x1312   :  { %v1404_v14 = vmul.f32 %v1745_v58, %v1403_v8  ;;  %v1410_v4 = vmul.f32 %v1747_v11, %v1398_v16  ;;  %vm1416_vm3 = vweird.f32 %v1747_v11 }
0x1313   :  { %vm1417_vm4 = vmor %vm1415_vm0, %vm1416_vm3 }
0x1314   :  { %v1408_v17 = vsel %vm1407_vm15, %v1745_v58, %v1404_v14  ;;  %v1411_v57 = vmul.f32 %v1747_v11, %v1410_v4 }
0x1315   :  { %v1419_v59 = vmul.f32 %v1408_v17, %v1385_v39 }
0x1316   :  { %v1412_v2 = vmul.f32 0.5, %v1411_v57 }
0x1317   :  { %v1422_v22 = vmul.f32 %v1421_v20, %v1419_v59 }
0x1318   :  { %v1413_v45 = vsub.f32 1.5, %v1412_v2 }
0x1319   :  { %v1425_v60 = vadd.f32 %v1424_v13, %v1422_v22 }
0x131a   :  { %v1414_v21 = vmul.f32 %v1747_v11, %v1413_v45 }
0x131b   :  { %v1428_v40 = vrot.slane %v1425_v60, 7 }
0x131c   :  { %v1418_v23 = vsel %vm1417_vm4, %v1747_v11, %v1414_v21 }
0x131d   :  { %v1420_v24 = vmul.f32 %v1418_v23, %v1386_v50 }
0x131f   :  { %v1423_v25 = vmul.f32 %v1421_v20, %v1420_v24 }
0x1321   :  { %v1426_v28 = vadd.f32 %v1424_v13, %v1423_v25 }
0x1323   :  { %v1431_v19 = vrot.slane %v1426_v28, 6 }
0x1325   :  { %v1434_v26 = vsel %vm1433_vm9, %v1428_v40, %v1431_v19 }
0x1326   :  { %v1439_v54 = vpack.c.bf16 %v1434_v26, %v1434_v26 }
0x1328   :  { %1596 = vmatmul.msk.bf16.vlgmr.msra.gmra.mxu2 %vm114_vm6, %v1439_v54 }
0x13ab   :  { %v1466_v41 = vpop.f32.mrf.mxu2 }
0x13ac   :  { %v1467_v30 = vadd.f32 %v1665_v29, %v1466_v41 }
0x13ae   :  { %1470 = vst [vmem:[#allocation2] sm:$0x3] %v1467_v30 }
0x13af   :  { %1481 = dma.vmem_to_hbm [thread:$0]  %s1477_s15, 32, %s1479_s1, [#allocation3]  }
0x13b3   :  { %v1468_v31 = vpop.f32.mrf.mxu2 }
0x13b4   :  { %1772 = dma.done.wait [#allocation3], 32  }
0x13b5   :  { %1773 = vsyncadd [#allocation3], 4294967264 }
0x13b6   :  { %1486 = vsyncpa [#allocation3], 1 }

</bundles_post_ra>
